<compile_context>
chip_gen: v5e
topology: v5e:2x2
jax: 0.10.0
libtpu: 0.0.40
codegen_flags: <defaults>
</compile_context>

<pallas_src>
import math

import jax
import jax.numpy as jnp
from jax import lax
from jax.experimental import pallas as pl
from jax.experimental.pallas import tpu as pltpu


# --------------------------- Fused MHA kernel ------------------------------ #
def _make_mha_kernel(h, d_k, d_model):
    """One grid step = one (batch b, q-tile qi) pair.

    Blocks (bf16 MXU inputs, f32 accumulation / softmax):
      q_ref   : (1, TQ, d_model) bf16      k_ref/v_ref : (1, Sk, d_model) bf16
      w*t_ref : (d_model, d_model) bf16 (pre-transposed; 1/sqrt(d_k) folded into Wq)
      b*_ref  : (1, d_model) f32           o_ref       : (1, TQ, d_model) f32
    Scratch (persists across grid steps):
      qp_ref  : (TQ, d_model) bf16   projected q tile
      kp_ref  : (Sk, d_model) bf16   projected keys   (filled once per batch, qi == 0)
      vp_ref  : (Sk, d_model) bf16   projected values (filled once per batch, qi == 0)
      ctx_ref : (TQ, d_model) bf16   merged per-head contexts
    """

    def proj_into(x, wt_ref, b_ref, dst_ref):
        # Full-K / full-N projection on the MXU: bf16 x bf16 -> f32, bias in f32,
        # result stored bf16 into VMEM scratch.
        y = lax.dot_general(
            x, wt_ref[...],
            dimension_numbers=(((1,), (0,)), ((), ())),
            preferred_element_type=jnp.float32,
        ) + b_ref[...]
        dst_ref[...] = y.astype(dst_ref.dtype)

    def kernel(q_ref, k_ref, v_ref,
               wqt_ref, bq_ref, wkt_ref, bk_ref, wvt_ref, bv_ref,
               wot_ref, bo_ref,
               o_ref,
               qp_ref, kp_ref, vp_ref, ctx_ref):
        qi = pl.program_id(1)

        # K / V projections are identical for every q tile of this batch: compute
        # them only on the first q tile and keep them in persistent scratch.
        # (Safe because the q-tile axis is "arbitrary", never megacore-sharded.)
        @pl.when(qi == 0)
        def _():
            proj_into(k_ref[0], wkt_ref, bk_ref, kp_ref)
            proj_into(v_ref[0], wvt_ref, bv_ref, vp_ref)

        # Q projection for the current tile (1/sqrt(d_k) already folded into Wq/bq).
        proj_into(q_ref[0], wqt_ref, bq_ref, qp_ref)

        # Per-head attention.  Head slabs are read straight from scratch and the
        # context is written straight back to the merged ctx scratch, so no
        # (S, d_model) SSA temporaries stay live across the head loop.
        for hi in range(h):
            sl = slice(hi * d_k, (hi + 1) * d_k)
            qh = qp_ref[:, sl]          # (TQ, d_k) bf16
            kh = kp_ref[:, sl]          # (Sk, d_k) bf16
            vh = vp_ref[:, sl]          # (Sk, d_k) bf16

            # scores = (q / sqrt(d_k)) @ k^T : contract d_k against d_k.
            s = lax.dot_general(
                qh, kh,
                dimension_numbers=(((1,), (1,)), ((), ())),
                preferred_element_type=jnp.float32,
            )                           # (TQ, Sk) f32

            # Numerically-stable softmax, all f32; reciprocal on the EUP slot.
            s = s - jnp.max(s, axis=-1, keepdims=True)
            e = jnp.exp(s)
            p = e * pl.reciprocal(jnp.sum(e, axis=-1, keepdims=True), approx=True)

            ctx_h = jnp.dot(p.astype(vh.dtype), vh,
                            preferred_element_type=jnp.float32)      # (TQ, d_k)
            ctx_ref[:, sl] = ctx_h.astype(ctx_ref.dtype)

        # ONE full-depth (K = d_model) output projection instead of h small
        # K=d_k, lane-sliced matmuls: keeps the MXU full and avoids relayouts.
        out = lax.dot_general(
            ctx_ref[...], wot_ref[...],
            dimension_numbers=(((1,), (0,)), ((), ())),
            preferred_element_type=jnp.float32,
        ) + bo_ref[...]
        o_ref[0] = out.astype(o_ref.dtype)          # lane-dense (TQ, d_model) store

    return kernel


def _pick_q_tile(sq):
    """Largest q-tile <= 512 that divides Sq and respects the sublane-8 rule."""
    for cand in (512, 256, 128, 64, 32, 16, 8):
        if sq % cand == 0:
            return cand
    return sq          # small / odd Sq: one full-length tile (block == full dim)


def _vmem_limit_bytes(tq, sk, d_model):
    weights = 4 * d_model * d_model * 2 * 2     # bf16, allow double-buffer fallback
    biases = 4 * d_model * 4 * 2
    q_blk = 2 * tq * d_model * 2
    kv_blk = 2 * 2 * sk * d_model * 2
    o_blk = 2 * tq * d_model * 4
    scratch = (2 * tq + 2 * sk) * d_model * 2
    temps = 4 * tq * sk * 4 + 6 * tq * d_model * 4
    total = weights + biases + q_blk + kv_blk + o_blk + scratch + temps
    return int(min(128 * 1024 * 1024, total + (16 << 20)))


def multi_headed_attention(params, query, key, value, h):
    """Forward pass equivalent to MultiHeadedAttention.forward (dropout = identity)."""
    (wq, bq), (wk, bk), (wv, bv), (wo, bo) = params
    B, Sq, d_model = query.shape
    Sk = key.shape[1]
    assert d_model % h == 0
    d_k = d_model // h
    scale = 1.0 / math.sqrt(d_k)

    tq = _pick_q_tile(Sq)
    n_q_tiles = Sq // tq

    # One-time host-side prep (amortized over all grid steps / calls):
    #  * pre-transposed weights -> plain (1,0)-contractions in the kernel,
    #  * 1/sqrt(d_k) folded into Wq and bq,
    #  * bf16 MXU inputs (activations + weights); biases stay f32.
    bf16 = jnp.bfloat16
    wqt = (wq.T * scale).astype(bf16)
    wkt = wk.T.astype(bf16)
    wvt = wv.T.astype(bf16)
    wot = wo.T.astype(bf16)
    bqs = (bq * scale).astype(jnp.float32).reshape(1, d_model)
    bk2 = bk.astype(jnp.float32).reshape(1, d_model)
    bv2 = bv.astype(jnp.float32).reshape(1, d_model)
    bo2 = bo.astype(jnp.float32).reshape(1, d_model)

    qx = query.astype(bf16)
    kx = key.astype(bf16)
    vx = value.astype(bf16)

    kernel = _make_mha_kernel(h, d_k, d_model)

    q_spec = pl.BlockSpec((1, tq, d_model), lambda b, qi: (b, qi, 0))
    kv_spec = pl.BlockSpec((1, Sk, d_model), lambda b, qi: (b, 0, 0))
    out_spec = pl.BlockSpec((1, tq, d_model), lambda b, qi: (b, qi, 0))

    def build(single_buffer_weights):
        if single_buffer_weights:
            # Constant index_map -> weights/biases never change across the grid;
            # single-buffer them to halve their resident VMEM footprint.
            w_spec = pl.BlockSpec((d_model, d_model), lambda b, qi: (0, 0),
                                  pipeline_mode=pl.Buffered(1))
            b_spec = pl.BlockSpec((1, d_model), lambda b, qi: (0, 0),
                                  pipeline_mode=pl.Buffered(1))
        else:
            w_spec = pl.BlockSpec((d_model, d_model), lambda b, qi: (0, 0))
            b_spec = pl.BlockSpec((1, d_model), lambda b, qi: (0, 0))

        return pl.pallas_call(
            kernel,
            out_shape=jax.ShapeDtypeStruct((B, Sq, d_model), jnp.float32),
            grid=(B, n_q_tiles),
            in_specs=[
                q_spec, kv_spec, kv_spec,
                w_spec, b_spec,   # Wq^T (pre-scaled), bq (pre-scaled)
                w_spec, b_spec,   # Wk^T, bk
                w_spec, b_spec,   # Wv^T, bv
                w_spec, b_spec,   # Wo^T, bo
            ],
            out_specs=out_spec,
            scratch_shapes=[
                pltpu.VMEM((tq, d_model), bf16),   # projected q tile
                pltpu.VMEM((Sk, d_model), bf16),   # projected keys (cached per batch)
                pltpu.VMEM((Sk, d_model), bf16),   # projected values (cached per batch)
                pltpu.VMEM((tq, d_model), bf16),   # merged per-head contexts
            ],
            compiler_params=pltpu.CompilerParams(
                # Batch axis shards across TensorCores; the q-tile axis must stay
                # "arbitrary" because the K/V projection cache is filled at qi == 0.
                dimension_semantics=("parallel", "arbitrary"),
                vmem_limit_bytes=_vmem_limit_bytes(tq, Sk, d_model),
            ),
        )

    args = (qx, kx, vx, wqt, bqs, wkt, bk2, wvt, bv2, wot, bo2)
    try:
        out = build(True)(*args)
        return jax.block_until_ready(out)
    except Exception:
        # Lowering paths without single-buffer (Buffered(1)) support: fall back
        # to the default double-buffered weight pipeline.
        return build(False)(*args)


# ------------------------------ Reference ---------------------------------- #
def _reference(params, query, key, value, h):
    (wq, bq), (wk, bk), (wv, bv), (wo, bo) = params
    B, Sq, d_model = query.shape
    Sk = key.shape[1]
    d_k = d_model // h

    def proj(x, w, b, S):
        return (x @ w.T + b).reshape(B, S, h, d_k).transpose(0, 2, 1, 3)

    q, k, v = proj(query, wq, bq, Sq), proj(key, wk, bk, Sk), proj(value, wv, bv, Sk)
    scores = jnp.einsum("bhqd,bhkd->bhqk", q, k) / math.sqrt(d_k)
    p = jax.nn.softmax(scores, axis=-1)
    x = jnp.einsum("bhqk,bhkd->bhqd", p, v)
    x = x.transpose(0, 2, 1, 3).reshape(B, Sq, d_model)
    return x @ wo.T + bo


# --------------------------------- Main ------------------------------------ #
if __name__ == "__main__":
    B, S, d_model, h = 2, 8, 32, 4

    key0 = jax.random.PRNGKey(0)
    keys = jax.random.split(key0, 12)

    def init_linear(kw, kb):
        w = jax.random.normal(kw, (d_model, d_model), jnp.float32) * 0.1
        b = jax.random.normal(kb, (d_model,), jnp.float32) * 0.1
        return w, b

    params = (
        init_linear(keys[0], keys[1]),   # W_q, b_q
        init_linear(keys[2], keys[3]),   # W_k, b_k
        init_linear(keys[4], keys[5]),   # W_v, b_v
        init_linear(keys[6], keys[7]),   # W_o, b_o
    )

    query = jax.random.normal(keys[8], (B, S, d_model), jnp.float32)
    key_in = jax.random.normal(keys[9], (B, S, d_model), jnp.float32)
    value = jax.random.normal(keys[10], (B, S, d_model), jnp.float32)

    out = multi_headed_attention(params, query, key_in, value, h)
    out = jax.block_until_ready(out)

    ref = _reference(params, query, key_in, value, h)
    assert out.shape == (B, S, d_model)
    # Tolerance accounts for bf16 MXU inputs and the approximate softmax reciprocal;
    # softmax and all accumulators are f32 inside the kernel.
    assert jnp.allclose(out, ref, atol=2e-2, rtol=2e-2), "mismatch vs reference"

    print("KERNEL_OK")
</pallas_src>

<mosaic_0001>
module attributes {stable_mosaic.version = 11 : i64} {
  func.func @kernel(%arg0: i32, %arg1: i32, %arg2: memref<1x8x32xbf16, #tpu.memory_space<vmem>>, %arg3: memref<1x8x32xbf16, #tpu.memory_space<vmem>>, %arg4: memref<1x8x32xbf16, #tpu.memory_space<vmem>>, %arg5: memref<32x32xbf16, #tpu.memory_space<vmem>>, %arg6: memref<1x32xf32, #tpu.memory_space<vmem>>, %arg7: memref<32x32xbf16, #tpu.memory_space<vmem>>, %arg8: memref<1x32xf32, #tpu.memory_space<vmem>>, %arg9: memref<32x32xbf16, #tpu.memory_space<vmem>>, %arg10: memref<1x32xf32, #tpu.memory_space<vmem>>, %arg11: memref<32x32xbf16, #tpu.memory_space<vmem>>, %arg12: memref<1x32xf32, #tpu.memory_space<vmem>>, %arg13: memref<1x8x32xf32, #tpu.memory_space<vmem>>, %arg14: memref<8x32xbf16, #tpu.memory_space<vmem>>, %arg15: memref<8x32xbf16, #tpu.memory_space<vmem>>, %arg16: memref<8x32xbf16, #tpu.memory_space<vmem>>, %arg17: memref<8x32xbf16, #tpu.memory_space<vmem>>) attributes {dimension_semantics = [#tpu.dimension_semantics<parallel>, #tpu.dimension_semantics<arbitrary>], iteration_bounds = array<i64: 2, 1>, scalar_prefetch = 0 : i64, scratch_operands = 4 : i64, tpu.core_type = #tpu.core_type<tc>, window_params = [{transform_indices = @transform_0, window_bounds = array<i64: 1, 8, 32>}, {transform_indices = @transform_1, window_bounds = array<i64: 1, 8, 32>}, {transform_indices = @transform_2, window_bounds = array<i64: 1, 8, 32>}, {pipeline_mode = #tpu.pipeline_mode<synchronous>, transform_indices = @transform_3, window_bounds = array<i64: 32, 32>}, {pipeline_mode = #tpu.pipeline_mode<synchronous>, transform_indices = @transform_4, window_bounds = array<i64: 1, 32>}, {pipeline_mode = #tpu.pipeline_mode<synchronous>, transform_indices = @transform_5, window_bounds = array<i64: 32, 32>}, {pipeline_mode = #tpu.pipeline_mode<synchronous>, transform_indices = @transform_6, window_bounds = array<i64: 1, 32>}, {pipeline_mode = #tpu.pipeline_mode<synchronous>, transform_indices = @transform_7, window_bounds = array<i64: 32, 32>}, {pipeline_mode = #tpu.pipeline_mode<synchronous>, transform_indices = @transform_8, window_bounds = array<i64: 1, 32>}, {pipeline_mode = #tpu.pipeline_mode<synchronous>, transform_indices = @transform_9, window_bounds = array<i64: 32, 32>}, {pipeline_mode = #tpu.pipeline_mode<synchronous>, transform_indices = @transform_10, window_bounds = array<i64: 1, 32>}, {transform_indices = @transform_11, window_bounds = array<i64: 1, 8, 32>}]} {
    %c0_i32 = arith.constant 0 : i32
    %0 = arith.cmpi eq, %arg1, %c0_i32 : i32
    %1 = arith.extui %0 : i1 to i32
    %c0_i32_0 = arith.constant 0 : i32
    %2 = arith.cmpi ne, %1, %c0_i32_0 : i32
    scf.if %2 {
      %c0_64 = arith.constant 0 : index
      %c0_65 = arith.constant 0 : index
      %c0_66 = arith.constant 0 : index
      %93 = vector.load %arg3[%c0_64, %c0_65, %c0_66] : memref<1x8x32xbf16, #tpu.memory_space<vmem>>, vector<1x8x32xbf16>
      %94 = vector.shape_cast %93 : vector<1x8x32xbf16> to vector<8x32xbf16>
      %c0_67 = arith.constant 0 : index
      %c0_68 = arith.constant 0 : index
      %95 = vector.load %arg7[%c0_67, %c0_68] : memref<32x32xbf16, #tpu.memory_space<vmem>>, vector<32x32xbf16>
      %cst_69 = arith.constant dense<0.000000e+00> : vector<8x32xf32>
      %96 = tpu.matmul %94, %95, %cst_69 {dimension_numbers = #tpu.dot_dimension_numbers<[1], [0], [0], [1], [0, 0, 1, 1], [], []>} : vector<8x32xbf16>, vector<32x32xbf16>, vector<8x32xf32> -> vector<8x32xf32>
      %c0_70 = arith.constant 0 : index
      %c0_71 = arith.constant 0 : index
      %97 = vector.load %arg8[%c0_70, %c0_71] : memref<1x32xf32, #tpu.memory_space<vmem>>, vector<1x32xf32>
      %98 = vector.broadcast %97 : vector<1x32xf32> to vector<8x32xf32>
      %99 = arith.addf %96, %98 : vector<8x32xf32>
      %100 = arith.truncf %99 : vector<8x32xf32> to vector<8x32xbf16>
      %c0_72 = arith.constant 0 : index
      %c0_73 = arith.constant 0 : index
      %101 = vector.load %arg15[%c0_72, %c0_73] : memref<8x32xbf16, #tpu.memory_space<vmem>>, vector<8x32xbf16>
      tpu.vector_store %arg15[%c0_72, %c0_73], %100 {strides = array<i32>} : memref<8x32xbf16, #tpu.memory_space<vmem>>, vector<8x32xbf16>,
      %c0_74 = arith.constant 0 : index
      %c0_75 = arith.constant 0 : index
      %c0_76 = arith.constant 0 : index
      %102 = vector.load %arg4[%c0_74, %c0_75, %c0_76] : memref<1x8x32xbf16, #tpu.memory_space<vmem>>, vector<1x8x32xbf16>
      %103 = vector.shape_cast %102 : vector<1x8x32xbf16> to vector<8x32xbf16>
      %c0_77 = arith.constant 0 : index
      %c0_78 = arith.constant 0 : index
      %104 = vector.load %arg9[%c0_77, %c0_78] : memref<32x32xbf16, #tpu.memory_space<vmem>>, vector<32x32xbf16>
      %cst_79 = arith.constant dense<0.000000e+00> : vector<8x32xf32>
      %105 = tpu.matmul %103, %104, %cst_79 {dimension_numbers = #tpu.dot_dimension_numbers<[1], [0], [0], [1], [0, 0, 1, 1], [], []>} : vector<8x32xbf16>, vector<32x32xbf16>, vector<8x32xf32> -> vector<8x32xf32>
      %c0_80 = arith.constant 0 : index
      %c0_81 = arith.constant 0 : index
      %106 = vector.load %arg10[%c0_80, %c0_81] : memref<1x32xf32, #tpu.memory_space<vmem>>, vector<1x32xf32>
      %107 = vector.broadcast %106 : vector<1x32xf32> to vector<8x32xf32>
      %108 = arith.addf %105, %107 : vector<8x32xf32>
      %109 = arith.truncf %108 : vector<8x32xf32> to vector<8x32xbf16>
      %c0_82 = arith.constant 0 : index
      %c0_83 = arith.constant 0 : index
      %110 = vector.load %arg16[%c0_82, %c0_83] : memref<8x32xbf16, #tpu.memory_space<vmem>>, vector<8x32xbf16>
      tpu.vector_store %arg16[%c0_82, %c0_83], %109 {strides = array<i32>} : memref<8x32xbf16, #tpu.memory_space<vmem>>, vector<8x32xbf16>,
    } else {
    }
    %c0 = arith.constant 0 : index
    %c0_1 = arith.constant 0 : index
    %c0_2 = arith.constant 0 : index
    %3 = vector.load %arg2[%c0, %c0_1, %c0_2] : memref<1x8x32xbf16, #tpu.memory_space<vmem>>, vector<1x8x32xbf16>
    %4 = vector.shape_cast %3 : vector<1x8x32xbf16> to vector<8x32xbf16>
    %c0_3 = arith.constant 0 : index
    %c0_4 = arith.constant 0 : index
    %5 = vector.load %arg5[%c0_3, %c0_4] : memref<32x32xbf16, #tpu.memory_space<vmem>>, vector<32x32xbf16>
    %cst = arith.constant dense<0.000000e+00> : vector<8x32xf32>
    %6 = tpu.matmul %4, %5, %cst {dimension_numbers = #tpu.dot_dimension_numbers<[1], [0], [0], [1], [0, 0, 1, 1], [], []>} : vector<8x32xbf16>, vector<32x32xbf16>, vector<8x32xf32> -> vector<8x32xf32>
    %c0_5 = arith.constant 0 : index
    %c0_6 = arith.constant 0 : index
    %7 = vector.load %arg6[%c0_5, %c0_6] : memref<1x32xf32, #tpu.memory_space<vmem>>, vector<1x32xf32>
    %8 = vector.broadcast %7 : vector<1x32xf32> to vector<8x32xf32>
    %9 = arith.addf %6, %8 : vector<8x32xf32>
    %10 = arith.truncf %9 : vector<8x32xf32> to vector<8x32xbf16>
    %c0_7 = arith.constant 0 : index
    %c0_8 = arith.constant 0 : index
    %11 = vector.load %arg14[%c0_7, %c0_8] : memref<8x32xbf16, #tpu.memory_space<vmem>>, vector<8x32xbf16>
    tpu.vector_store %arg14[%c0_7, %c0_8], %10 {strides = array<i32>} : memref<8x32xbf16, #tpu.memory_space<vmem>>, vector<8x32xbf16>,
    %c0_9 = arith.constant 0 : index
    %c0_10 = arith.constant 0 : index
    %12 = vector.load %arg14[%c0_9, %c0_10] : memref<8x32xbf16, #tpu.memory_space<vmem>>, vector<8x8xbf16>
    %c0_11 = arith.constant 0 : index
    %c0_12 = arith.constant 0 : index
    %13 = vector.load %arg15[%c0_11, %c0_12] : memref<8x32xbf16, #tpu.memory_space<vmem>>, vector<8x8xbf16>
    %c0_13 = arith.constant 0 : index
    %c0_14 = arith.constant 0 : index
    %14 = vector.load %arg16[%c0_13, %c0_14] : memref<8x32xbf16, #tpu.memory_space<vmem>>, vector<8x8xbf16>
    %cst_15 = arith.constant dense<0.000000e+00> : vector<8x8xf32>
    %15 = tpu.matmul %12, %13, %cst_15 {dimension_numbers = #tpu.dot_dimension_numbers<[1], [1], [0], [0], [0, 0, 1, 0], [], []>} : vector<8x8xbf16>, vector<8x8xbf16>, vector<8x8xf32> -> vector<8x8xf32>
    %cst_16 = arith.constant dense<0xFF800000> : vector<8xf32>
    %16 = vector.multi_reduction <maximumf>, %15, %cst_16 [1] : vector<8x8xf32> to vector<8xf32>
    %17 = vector.shape_cast %16 : vector<8xf32> to vector<8x1xf32>
    %18 = vector.broadcast %17 : vector<8x1xf32> to vector<8x8xf32>
    %19 = arith.subf %15, %18 : vector<8x8xf32>
    %20 = math.exp %19 : vector<8x8xf32>
    %cst_17 = arith.constant dense<0.000000e+00> : vector<8xf32>
    %21 = vector.multi_reduction <add>, %20, %cst_17 [1] : vector<8x8xf32> to vector<8xf32>
    %22 = vector.shape_cast %21 : vector<8xf32> to vector<8x1xf32>
    %23 = tpu.reciprocal %22 {approx = true} : vector<8x1xf32> -> vector<8x1xf32>
    %24 = vector.broadcast %23 : vector<8x1xf32> to vector<8x8xf32>
    %25 = arith.mulf %20, %24 : vector<8x8xf32>
    %26 = arith.truncf %25 : vector<8x8xf32> to vector<8x8xbf16>
    %cst_18 = arith.constant dense<0.000000e+00> : vector<8x8xf32>
    %27 = tpu.matmul %26, %14, %cst_18 {dimension_numbers = #tpu.dot_dimension_numbers<[1], [0], [0], [1], [0, 0, 1, 1], [], []>} : vector<8x8xbf16>, vector<8x8xbf16>, vector<8x8xf32> -> vector<8x8xf32>
    %28 = arith.truncf %27 : vector<8x8xf32> to vector<8x8xbf16>
    %c0_19 = arith.constant 0 : index
    %c0_20 = arith.constant 0 : index
    %29 = vector.load %arg17[%c0_19, %c0_20] : memref<8x32xbf16, #tpu.memory_space<vmem>>, vector<8x8xbf16>
    tpu.vector_store %arg17[%c0_19, %c0_20], %28 {strides = array<i32>} : memref<8x32xbf16, #tpu.memory_space<vmem>>, vector<8x8xbf16>,
    %c0_21 = arith.constant 0 : index
    %c8 = arith.constant 8 : index
    %30 = vector.load %arg14[%c0_21, %c8] : memref<8x32xbf16, #tpu.memory_space<vmem>>, vector<8x8xbf16>
    %c0_22 = arith.constant 0 : index
    %c8_23 = arith.constant 8 : index
    %31 = vector.load %arg15[%c0_22, %c8_23] : memref<8x32xbf16, #tpu.memory_space<vmem>>, vector<8x8xbf16>
    %c0_24 = arith.constant 0 : index
    %c8_25 = arith.constant 8 : index
    %32 = vector.load %arg16[%c0_24, %c8_25] : memref<8x32xbf16, #tpu.memory_space<vmem>>, vector<8x8xbf16>
    %cst_26 = arith.constant dense<0.000000e+00> : vector<8x8xf32>
    %33 = tpu.matmul %30, %31, %cst_26 {dimension_numbers = #tpu.dot_dimension_numbers<[1], [1], [0], [0], [0, 0, 1, 0], [], []>} : vector<8x8xbf16>, vector<8x8xbf16>, vector<8x8xf32> -> vector<8x8xf32>
    %cst_27 = arith.constant dense<0xFF800000> : vector<8xf32>
    %34 = vector.multi_reduction <maximumf>, %33, %cst_27 [1] : vector<8x8xf32> to vector<8xf32>
    %35 = vector.shape_cast %34 : vector<8xf32> to vector<8x1xf32>
    %36 = vector.broadcast %35 : vector<8x1xf32> to vector<8x8xf32>
    %37 = arith.subf %33, %36 : vector<8x8xf32>
    %38 = math.exp %37 : vector<8x8xf32>
    %cst_28 = arith.constant dense<0.000000e+00> : vector<8xf32>
    %39 = vector.multi_reduction <add>, %38, %cst_28 [1] : vector<8x8xf32> to vector<8xf32>
    %40 = vector.shape_cast %39 : vector<8xf32> to vector<8x1xf32>
    %41 = tpu.reciprocal %40 {approx = true} : vector<8x1xf32> -> vector<8x1xf32>
    %42 = vector.broadcast %41 : vector<8x1xf32> to vector<8x8xf32>
    %43 = arith.mulf %38, %42 : vector<8x8xf32>
    %44 = arith.truncf %43 : vector<8x8xf32> to vector<8x8xbf16>
    %cst_29 = arith.constant dense<0.000000e+00> : vector<8x8xf32>
    %45 = tpu.matmul %44, %32, %cst_29 {dimension_numbers = #tpu.dot_dimension_numbers<[1], [0], [0], [1], [0, 0, 1, 1], [], []>} : vector<8x8xbf16>, vector<8x8xbf16>, vector<8x8xf32> -> vector<8x8xf32>
    %46 = arith.truncf %45 : vector<8x8xf32> to vector<8x8xbf16>
    %c0_30 = arith.constant 0 : index
    %c8_31 = arith.constant 8 : index
    %47 = vector.load %arg17[%c0_30, %c8_31] : memref<8x32xbf16, #tpu.memory_space<vmem>>, vector<8x8xbf16>
    tpu.vector_store %arg17[%c0_30, %c8_31], %46 {strides = array<i32>} : memref<8x32xbf16, #tpu.memory_space<vmem>>, vector<8x8xbf16>,
    %c0_32 = arith.constant 0 : index
    %c16 = arith.constant 16 : index
    %48 = vector.load %arg14[%c0_32, %c16] : memref<8x32xbf16, #tpu.memory_space<vmem>>, vector<8x8xbf16>
    %c0_33 = arith.constant 0 : index
    %c16_34 = arith.constant 16 : index
    %49 = vector.load %arg15[%c0_33, %c16_34] : memref<8x32xbf16, #tpu.memory_space<vmem>>, vector<8x8xbf16>
    %c0_35 = arith.constant 0 : index
    %c16_36 = arith.constant 16 : index
    %50 = vector.load %arg16[%c0_35, %c16_36] : memref<8x32xbf16, #tpu.memory_space<vmem>>, vector<8x8xbf16>
    %cst_37 = arith.constant dense<0.000000e+00> : vector<8x8xf32>
    %51 = tpu.matmul %48, %49, %cst_37 {dimension_numbers = #tpu.dot_dimension_numbers<[1], [1], [0], [0], [0, 0, 1, 0], [], []>} : vector<8x8xbf16>, vector<8x8xbf16>, vector<8x8xf32> -> vector<8x8xf32>
    %cst_38 = arith.constant dense<0xFF800000> : vector<8xf32>
    %52 = vector.multi_reduction <maximumf>, %51, %cst_38 [1] : vector<8x8xf32> to vector<8xf32>
    %53 = vector.shape_cast %52 : vector<8xf32> to vector<8x1xf32>
    %54 = vector.broadcast %53 : vector<8x1xf32> to vector<8x8xf32>
    %55 = arith.subf %51, %54 : vector<8x8xf32>
    %56 = math.exp %55 : vector<8x8xf32>
    %cst_39 = arith.constant dense<0.000000e+00> : vector<8xf32>
    %57 = vector.multi_reduction <add>, %56, %cst_39 [1] : vector<8x8xf32> to vector<8xf32>
    %58 = vector.shape_cast %57 : vector<8xf32> to vector<8x1xf32>
    %59 = tpu.reciprocal %58 {approx = true} : vector<8x1xf32> -> vector<8x1xf32>
    %60 = vector.broadcast %59 : vector<8x1xf32> to vector<8x8xf32>
    %61 = arith.mulf %56, %60 : vector<8x8xf32>
    %62 = arith.truncf %61 : vector<8x8xf32> to vector<8x8xbf16>
    %cst_40 = arith.constant dense<0.000000e+00> : vector<8x8xf32>
    %63 = tpu.matmul %62, %50, %cst_40 {dimension_numbers = #tpu.dot_dimension_numbers<[1], [0], [0], [1], [0, 0, 1, 1], [], []>} : vector<8x8xbf16>, vector<8x8xbf16>, vector<8x8xf32> -> vector<8x8xf32>
    %64 = arith.truncf %63 : vector<8x8xf32> to vector<8x8xbf16>
    %c0_41 = arith.constant 0 : index
    %c16_42 = arith.constant 16 : index
    %65 = vector.load %arg17[%c0_41, %c16_42] : memref<8x32xbf16, #tpu.memory_space<vmem>>, vector<8x8xbf16>
    tpu.vector_store %arg17[%c0_41, %c16_42], %64 {strides = array<i32>} : memref<8x32xbf16, #tpu.memory_space<vmem>>, vector<8x8xbf16>,
    %c0_43 = arith.constant 0 : index
    %c24 = arith.constant 24 : index
    %66 = vector.load %arg14[%c0_43, %c24] : memref<8x32xbf16, #tpu.memory_space<vmem>>, vector<8x8xbf16>
    %c0_44 = arith.constant 0 : index
    %c24_45 = arith.constant 24 : index
    %67 = vector.load %arg15[%c0_44, %c24_45] : memref<8x32xbf16, #tpu.memory_space<vmem>>, vector<8x8xbf16>
    %c0_46 = arith.constant 0 : index
    %c24_47 = arith.constant 24 : index
    %68 = vector.load %arg16[%c0_46, %c24_47] : memref<8x32xbf16, #tpu.memory_space<vmem>>, vector<8x8xbf16>
    %cst_48 = arith.constant dense<0.000000e+00> : vector<8x8xf32>
    %69 = tpu.matmul %66, %67, %cst_48 {dimension_numbers = #tpu.dot_dimension_numbers<[1], [1], [0], [0], [0, 0, 1, 0], [], []>} : vector<8x8xbf16>, vector<8x8xbf16>, vector<8x8xf32> -> vector<8x8xf32>
    %cst_49 = arith.constant dense<0xFF800000> : vector<8xf32>
    %70 = vector.multi_reduction <maximumf>, %69, %cst_49 [1] : vector<8x8xf32> to vector<8xf32>
    %71 = vector.shape_cast %70 : vector<8xf32> to vector<8x1xf32>
    %72 = vector.broadcast %71 : vector<8x1xf32> to vector<8x8xf32>
    %73 = arith.subf %69, %72 : vector<8x8xf32>
    %74 = math.exp %73 : vector<8x8xf32>
    %cst_50 = arith.constant dense<0.000000e+00> : vector<8xf32>
    %75 = vector.multi_reduction <add>, %74, %cst_50 [1] : vector<8x8xf32> to vector<8xf32>
    %76 = vector.shape_cast %75 : vector<8xf32> to vector<8x1xf32>
    %77 = tpu.reciprocal %76 {approx = true} : vector<8x1xf32> -> vector<8x1xf32>
    %78 = vector.broadcast %77 : vector<8x1xf32> to vector<8x8xf32>
    %79 = arith.mulf %74, %78 : vector<8x8xf32>
    %80 = arith.truncf %79 : vector<8x8xf32> to vector<8x8xbf16>
    %cst_51 = arith.constant dense<0.000000e+00> : vector<8x8xf32>
    %81 = tpu.matmul %80, %68, %cst_51 {dimension_numbers = #tpu.dot_dimension_numbers<[1], [0], [0], [1], [0, 0, 1, 1], [], []>} : vector<8x8xbf16>, vector<8x8xbf16>, vector<8x8xf32> -> vector<8x8xf32>
    %82 = arith.truncf %81 : vector<8x8xf32> to vector<8x8xbf16>
    %c0_52 = arith.constant 0 : index
    %c24_53 = arith.constant 24 : index
    %83 = vector.load %arg17[%c0_52, %c24_53] : memref<8x32xbf16, #tpu.memory_space<vmem>>, vector<8x8xbf16>
    tpu.vector_store %arg17[%c0_52, %c24_53], %82 {strides = array<i32>} : memref<8x32xbf16, #tpu.memory_space<vmem>>, vector<8x8xbf16>,
    %c0_54 = arith.constant 0 : index
    %c0_55 = arith.constant 0 : index
    %84 = vector.load %arg17[%c0_54, %c0_55] : memref<8x32xbf16, #tpu.memory_space<vmem>>, vector<8x32xbf16>
    %c0_56 = arith.constant 0 : index
    %c0_57 = arith.constant 0 : index
    %85 = vector.load %arg11[%c0_56, %c0_57] : memref<32x32xbf16, #tpu.memory_space<vmem>>, vector<32x32xbf16>
    %cst_58 = arith.constant dense<0.000000e+00> : vector<8x32xf32>
    %86 = tpu.matmul %84, %85, %cst_58 {dimension_numbers = #tpu.dot_dimension_numbers<[1], [0], [0], [1], [0, 0, 1, 1], [], []>} : vector<8x32xbf16>, vector<32x32xbf16>, vector<8x32xf32> -> vector<8x32xf32>
    %c0_59 = arith.constant 0 : index
    %c0_60 = arith.constant 0 : index
    %87 = vector.load %arg12[%c0_59, %c0_60] : memref<1x32xf32, #tpu.memory_space<vmem>>, vector<1x32xf32>
    %88 = vector.broadcast %87 : vector<1x32xf32> to vector<8x32xf32>
    %89 = arith.addf %86, %88 : vector<8x32xf32>
    %c0_61 = arith.constant 0 : index
    %c0_62 = arith.constant 0 : index
    %c0_63 = arith.constant 0 : index
    %90 = vector.load %arg13[%c0_61, %c0_62, %c0_63] : memref<1x8x32xf32, #tpu.memory_space<vmem>>, vector<1x8x32xf32>
    %91 = vector.shape_cast %90 : vector<1x8x32xf32> to vector<8x32xf32>
    %92 = vector.shape_cast %89 : vector<8x32xf32> to vector<1x8x32xf32>
    tpu.vector_store %arg13[%c0_61, %c0_62, %c0_63], %92 {strides = array<i32>} : memref<1x8x32xf32, #tpu.memory_space<vmem>>, vector<1x8x32xf32>,
    return
  }
  func.func @transform_0(%arg0: i32, %arg1: i32) -> (i32, i32, i32) {
    %c0_i32 = arith.constant 0 : i32
    %c0_i32_0 = arith.constant 0 : i32
    return %arg0, %arg1, %c0_i32 : i32, i32, i32
  }
  func.func @transform_1(%arg0: i32, %arg1: i32) -> (i32, i32, i32) {
    %c0_i32 = arith.constant 0 : i32
    %c0_i32_0 = arith.constant 0 : i32
    %c0_i32_1 = arith.constant 0 : i32
    return %arg0, %c0_i32, %c0_i32_0 : i32, i32, i32
  }
  func.func @transform_2(%arg0: i32, %arg1: i32) -> (i32, i32, i32) {
    %c0_i32 = arith.constant 0 : i32
    %c0_i32_0 = arith.constant 0 : i32
    %c0_i32_1 = arith.constant 0 : i32
    return %arg0, %c0_i32, %c0_i32_0 : i32, i32, i32
  }
  func.func @transform_3(%arg0: i32, %arg1: i32) -> (i32, i32) {
    %c0_i32 = arith.constant 0 : i32
    %c0_i32_0 = arith.constant 0 : i32
    %c0_i32_1 = arith.constant 0 : i32
    return %c0_i32, %c0_i32_0 : i32, i32
  }
  func.func @transform_4(%arg0: i32, %arg1: i32) -> (i32, i32) {
    %c0_i32 = arith.constant 0 : i32
    %c0_i32_0 = arith.constant 0 : i32
    %c0_i32_1 = arith.constant 0 : i32
    return %c0_i32, %c0_i32_0 : i32, i32
  }
  func.func @transform_5(%arg0: i32, %arg1: i32) -> (i32, i32) {
    %c0_i32 = arith.constant 0 : i32
    %c0_i32_0 = arith.constant 0 : i32
    %c0_i32_1 = arith.constant 0 : i32
    return %c0_i32, %c0_i32_0 : i32, i32
  }
  func.func @transform_6(%arg0: i32, %arg1: i32) -> (i32, i32) {
    %c0_i32 = arith.constant 0 : i32
    %c0_i32_0 = arith.constant 0 : i32
    %c0_i32_1 = arith.constant 0 : i32
    return %c0_i32, %c0_i32_0 : i32, i32
  }
  func.func @transform_7(%arg0: i32, %arg1: i32) -> (i32, i32) {
    %c0_i32 = arith.constant 0 : i32
    %c0_i32_0 = arith.constant 0 : i32
    %c0_i32_1 = arith.constant 0 : i32
    return %c0_i32, %c0_i32_0 : i32, i32
  }
  func.func @transform_8(%arg0: i32, %arg1: i32) -> (i32, i32) {
    %c0_i32 = arith.constant 0 : i32
    %c0_i32_0 = arith.constant 0 : i32
    %c0_i32_1 = arith.constant 0 : i32
    return %c0_i32, %c0_i32_0 : i32, i32
  }
  func.func @transform_9(%arg0: i32, %arg1: i32) -> (i32, i32) {
    %c0_i32 = arith.constant 0 : i32
    %c0_i32_0 = arith.constant 0 : i32
    %c0_i32_1 = arith.constant 0 : i32
    return %c0_i32, %c0_i32_0 : i32, i32
  }
  func.func @transform_10(%arg0: i32, %arg1: i32) -> (i32, i32) {
    %c0_i32 = arith.constant 0 : i32
    %c0_i32_0 = arith.constant 0 : i32
    %c0_i32_1 = arith.constant 0 : i32
    return %c0_i32, %c0_i32_0 : i32, i32
  }
  func.func @transform_11(%arg0: i32, %arg1: i32) -> (i32, i32, i32) {
    %c0_i32 = arith.constant 0 : i32
    %c0_i32_0 = arith.constant 0 : i32
    return %arg0, %arg1, %c0_i32 : i32, i32, i32
  }
}

module attributes {stable_mosaic.version = 11 : i64} {
  func.func @kernel(%arg0: i32, %arg1: i32, %arg2: memref<1x8x32xbf16, #tpu.memory_space<vmem>>, %arg3: memref<1x8x32xbf16, #tpu.memory_space<vmem>>, %arg4: memref<1x8x32xbf16, #tpu.memory_space<vmem>>, %arg5: memref<32x32xbf16, #tpu.memory_space<vmem>>, %arg6: memref<1x32xf32, #tpu.memory_space<vmem>>, %arg7: memref<32x32xbf16, #tpu.memory_space<vmem>>, %arg8: memref<1x32xf32, #tpu.memory_space<vmem>>, %arg9: memref<32x32xbf16, #tpu.memory_space<vmem>>, %arg10: memref<1x32xf32, #tpu.memory_space<vmem>>, %arg11: memref<32x32xbf16, #tpu.memory_space<vmem>>, %arg12: memref<1x32xf32, #tpu.memory_space<vmem>>, %arg13: memref<1x8x32xf32, #tpu.memory_space<vmem>>, %arg14: memref<8x32xbf16, #tpu.memory_space<vmem>>, %arg15: memref<8x32xbf16, #tpu.memory_space<vmem>>, %arg16: memref<8x32xbf16, #tpu.memory_space<vmem>>, %arg17: memref<8x32xbf16, #tpu.memory_space<vmem>>) attributes {dimension_semantics = [#tpu.dimension_semantics<parallel>, #tpu.dimension_semantics<arbitrary>], iteration_bounds = array<i64: 2, 1>, scalar_prefetch = 0 : i64, scratch_operands = 4 : i64, tpu.core_type = #tpu.core_type<tc>, window_params = [{transform_indices = @transform_0, window_bounds = array<i64: 1, 8, 32>}, {transform_indices = @transform_1, window_bounds = array<i64: 1, 8, 32>}, {transform_indices = @transform_2, window_bounds = array<i64: 1, 8, 32>}, {pipeline_mode = #tpu.pipeline_mode<synchronous>, transform_indices = @transform_3, window_bounds = array<i64: 32, 32>}, {pipeline_mode = #tpu.pipeline_mode<synchronous>, transform_indices = @transform_4, window_bounds = array<i64: 1, 32>}, {pipeline_mode = #tpu.pipeline_mode<synchronous>, transform_indices = @transform_5, window_bounds = array<i64: 32, 32>}, {pipeline_mode = #tpu.pipeline_mode<synchronous>, transform_indices = @transform_6, window_bounds = array<i64: 1, 32>}, {pipeline_mode = #tpu.pipeline_mode<synchronous>, transform_indices = @transform_7, window_bounds = array<i64: 32, 32>}, {pipeline_mode = #tpu.pipeline_mode<synchronous>, transform_indices = @transform_8, window_bounds = array<i64: 1, 32>}, {pipeline_mode = #tpu.pipeline_mode<synchronous>, transform_indices = @transform_9, window_bounds = array<i64: 32, 32>}, {pipeline_mode = #tpu.pipeline_mode<synchronous>, transform_indices = @transform_10, window_bounds = array<i64: 1, 32>}, {transform_indices = @transform_11, window_bounds = array<i64: 1, 8, 32>}]} {
    %c0_i32 = arith.constant 0 : i32
    %0 = arith.cmpi eq, %arg1, %c0_i32 : i32
    %1 = arith.extui %0 : i1 to i32
    %c0_i32_0 = arith.constant 0 : i32
    %2 = arith.cmpi ne, %1, %c0_i32_0 : i32
    scf.if %2 {
      %c0_64 = arith.constant 0 : index
      %c0_65 = arith.constant 0 : index
      %c0_66 = arith.constant 0 : index
      %93 = vector.load %arg3[%c0_64, %c0_65, %c0_66] : memref<1x8x32xbf16, #tpu.memory_space<vmem>>, vector<1x8x32xbf16>
      %94 = vector.shape_cast %93 : vector<1x8x32xbf16> to vector<8x32xbf16>
      %c0_67 = arith.constant 0 : index
      %c0_68 = arith.constant 0 : index
      %95 = vector.load %arg7[%c0_67, %c0_68] : memref<32x32xbf16, #tpu.memory_space<vmem>>, vector<32x32xbf16>
      %cst_69 = arith.constant dense<0.000000e+00> : vector<8x32xf32>
      %96 = tpu.matmul %94, %95, %cst_69 {dimension_numbers = #tpu.dot_dimension_numbers<[1], [0], [0], [1], [0, 0, 1, 1], [], []>} : vector<8x32xbf16>, vector<32x32xbf16>, vector<8x32xf32> -> vector<8x32xf32>
      %c0_70 = arith.constant 0 : index
      %c0_71 = arith.constant 0 : index
      %97 = vector.load %arg8[%c0_70, %c0_71] : memref<1x32xf32, #tpu.memory_space<vmem>>, vector<1x32xf32>
      %98 = vector.broadcast %97 : vector<1x32xf32> to vector<8x32xf32>
      %99 = arith.addf %96, %98 : vector<8x32xf32>
      %100 = arith.truncf %99 : vector<8x32xf32> to vector<8x32xbf16>
      %c0_72 = arith.constant 0 : index
      %c0_73 = arith.constant 0 : index
      %101 = vector.load %arg15[%c0_72, %c0_73] : memref<8x32xbf16, #tpu.memory_space<vmem>>, vector<8x32xbf16>
      tpu.vector_store %arg15[%c0_72, %c0_73], %100 {strides = array<i32>} : memref<8x32xbf16, #tpu.memory_space<vmem>>, vector<8x32xbf16>,
      %c0_74 = arith.constant 0 : index
      %c0_75 = arith.constant 0 : index
      %c0_76 = arith.constant 0 : index
      %102 = vector.load %arg4[%c0_74, %c0_75, %c0_76] : memref<1x8x32xbf16, #tpu.memory_space<vmem>>, vector<1x8x32xbf16>
      %103 = vector.shape_cast %102 : vector<1x8x32xbf16> to vector<8x32xbf16>
      %c0_77 = arith.constant 0 : index
      %c0_78 = arith.constant 0 : index
      %104 = vector.load %arg9[%c0_77, %c0_78] : memref<32x32xbf16, #tpu.memory_space<vmem>>, vector<32x32xbf16>
      %cst_79 = arith.constant dense<0.000000e+00> : vector<8x32xf32>
      %105 = tpu.matmul %103, %104, %cst_79 {dimension_numbers = #tpu.dot_dimension_numbers<[1], [0], [0], [1], [0, 0, 1, 1], [], []>} : vector<8x32xbf16>, vector<32x32xbf16>, vector<8x32xf32> -> vector<8x32xf32>
      %c0_80 = arith.constant 0 : index
      %c0_81 = arith.constant 0 : index
      %106 = vector.load %arg10[%c0_80, %c0_81] : memref<1x32xf32, #tpu.memory_space<vmem>>, vector<1x32xf32>
      %107 = vector.broadcast %106 : vector<1x32xf32> to vector<8x32xf32>
      %108 = arith.addf %105, %107 : vector<8x32xf32>
      %109 = arith.truncf %108 : vector<8x32xf32> to vector<8x32xbf16>
      %c0_82 = arith.constant 0 : index
      %c0_83 = arith.constant 0 : index
      %110 = vector.load %arg16[%c0_82, %c0_83] : memref<8x32xbf16, #tpu.memory_space<vmem>>, vector<8x32xbf16>
      tpu.vector_store %arg16[%c0_82, %c0_83], %109 {strides = array<i32>} : memref<8x32xbf16, #tpu.memory_space<vmem>>, vector<8x32xbf16>,
    } else {
    }
    %c0 = arith.constant 0 : index
    %c0_1 = arith.constant 0 : index
    %c0_2 = arith.constant 0 : index
    %3 = vector.load %arg2[%c0, %c0_1, %c0_2] : memref<1x8x32xbf16, #tpu.memory_space<vmem>>, vector<1x8x32xbf16>
    %4 = vector.shape_cast %3 : vector<1x8x32xbf16> to vector<8x32xbf16>
    %c0_3 = arith.constant 0 : index
    %c0_4 = arith.constant 0 : index
    %5 = vector.load %arg5[%c0_3, %c0_4] : memref<32x32xbf16, #tpu.memory_space<vmem>>, vector<32x32xbf16>
    %cst = arith.constant dense<0.000000e+00> : vector<8x32xf32>
    %6 = tpu.matmul %4, %5, %cst {dimension_numbers = #tpu.dot_dimension_numbers<[1], [0], [0], [1], [0, 0, 1, 1], [], []>} : vector<8x32xbf16>, vector<32x32xbf16>, vector<8x32xf32> -> vector<8x32xf32>
    %c0_5 = arith.constant 0 : index
    %c0_6 = arith.constant 0 : index
    %7 = vector.load %arg6[%c0_5, %c0_6] : memref<1x32xf32, #tpu.memory_space<vmem>>, vector<1x32xf32>
    %8 = vector.broadcast %7 : vector<1x32xf32> to vector<8x32xf32>
    %9 = arith.addf %6, %8 : vector<8x32xf32>
    %10 = arith.truncf %9 : vector<8x32xf32> to vector<8x32xbf16>
    %c0_7 = arith.constant 0 : index
    %c0_8 = arith.constant 0 : index
    %11 = vector.load %arg14[%c0_7, %c0_8] : memref<8x32xbf16, #tpu.memory_space<vmem>>, vector<8x32xbf16>
    tpu.vector_store %arg14[%c0_7, %c0_8], %10 {strides = array<i32>} : memref<8x32xbf16, #tpu.memory_space<vmem>>, vector<8x32xbf16>,
    %c0_9 = arith.constant 0 : index
    %c0_10 = arith.constant 0 : index
    %12 = vector.load %arg14[%c0_9, %c0_10] : memref<8x32xbf16, #tpu.memory_space<vmem>>, vector<8x8xbf16>
    %c0_11 = arith.constant 0 : index
    %c0_12 = arith.constant 0 : index
    %13 = vector.load %arg15[%c0_11, %c0_12] : memref<8x32xbf16, #tpu.memory_space<vmem>>, vector<8x8xbf16>
    %c0_13 = arith.constant 0 : index
    %c0_14 = arith.constant 0 : index
    %14 = vector.load %arg16[%c0_13, %c0_14] : memref<8x32xbf16, #tpu.memory_space<vmem>>, vector<8x8xbf16>
    %cst_15 = arith.constant dense<0.000000e+00> : vector<8x8xf32>
    %15 = tpu.matmul %12, %13, %cst_15 {dimension_numbers = #tpu.dot_dimension_numbers<[1], [1], [0], [0], [0, 0, 1, 0], [], []>} : vector<8x8xbf16>, vector<8x8xbf16>, vector<8x8xf32> -> vector<8x8xf32>
    %cst_16 = arith.constant dense<0xFF800000> : vector<8xf32>
    %16 = vector.multi_reduction <maximumf>, %15, %cst_16 [1] : vector<8x8xf32> to vector<8xf32>
    %17 = vector.shape_cast %16 : vector<8xf32> to vector<8x1xf32>
    %18 = vector.broadcast %17 : vector<8x1xf32> to vector<8x8xf32>
    %19 = arith.subf %15, %18 : vector<8x8xf32>
    %20 = math.exp %19 : vector<8x8xf32>
    %cst_17 = arith.constant dense<0.000000e+00> : vector<8xf32>
    %21 = vector.multi_reduction <add>, %20, %cst_17 [1] : vector<8x8xf32> to vector<8xf32>
    %22 = vector.shape_cast %21 : vector<8xf32> to vector<8x1xf32>
    %23 = tpu.reciprocal %22 {approx = true} : vector<8x1xf32> -> vector<8x1xf32>
    %24 = vector.broadcast %23 : vector<8x1xf32> to vector<8x8xf32>
    %25 = arith.mulf %20, %24 : vector<8x8xf32>
    %26 = arith.truncf %25 : vector<8x8xf32> to vector<8x8xbf16>
    %cst_18 = arith.constant dense<0.000000e+00> : vector<8x8xf32>
    %27 = tpu.matmul %26, %14, %cst_18 {dimension_numbers = #tpu.dot_dimension_numbers<[1], [0], [0], [1], [0, 0, 1, 1], [], []>} : vector<8x8xbf16>, vector<8x8xbf16>, vector<8x8xf32> -> vector<8x8xf32>
    %28 = arith.truncf %27 : vector<8x8xf32> to vector<8x8xbf16>
    %c0_19 = arith.constant 0 : index
    %c0_20 = arith.constant 0 : index
    %29 = vector.load %arg17[%c0_19, %c0_20] : memref<8x32xbf16, #tpu.memory_space<vmem>>, vector<8x8xbf16>
    tpu.vector_store %arg17[%c0_19, %c0_20], %28 {strides = array<i32>} : memref<8x32xbf16, #tpu.memory_space<vmem>>, vector<8x8xbf16>,
    %c0_21 = arith.constant 0 : index
    %c8 = arith.constant 8 : index
    %30 = vector.load %arg14[%c0_21, %c8] : memref<8x32xbf16, #tpu.memory_space<vmem>>, vector<8x8xbf16>
    %c0_22 = arith.constant 0 : index
    %c8_23 = arith.constant 8 : index
    %31 = vector.load %arg15[%c0_22, %c8_23] : memref<8x32xbf16, #tpu.memory_space<vmem>>, vector<8x8xbf16>
    %c0_24 = arith.constant 0 : index
    %c8_25 = arith.constant 8 : index
    %32 = vector.load %arg16[%c0_24, %c8_25] : memref<8x32xbf16, #tpu.memory_space<vmem>>, vector<8x8xbf16>
    %cst_26 = arith.constant dense<0.000000e+00> : vector<8x8xf32>
    %33 = tpu.matmul %30, %31, %cst_26 {dimension_numbers = #tpu.dot_dimension_numbers<[1], [1], [0], [0], [0, 0, 1, 0], [], []>} : vector<8x8xbf16>, vector<8x8xbf16>, vector<8x8xf32> -> vector<8x8xf32>
    %cst_27 = arith.constant dense<0xFF800000> : vector<8xf32>
    %34 = vector.multi_reduction <maximumf>, %33, %cst_27 [1] : vector<8x8xf32> to vector<8xf32>
    %35 = vector.shape_cast %34 : vector<8xf32> to vector<8x1xf32>
    %36 = vector.broadcast %35 : vector<8x1xf32> to vector<8x8xf32>
    %37 = arith.subf %33, %36 : vector<8x8xf32>
    %38 = math.exp %37 : vector<8x8xf32>
    %cst_28 = arith.constant dense<0.000000e+00> : vector<8xf32>
    %39 = vector.multi_reduction <add>, %38, %cst_28 [1] : vector<8x8xf32> to vector<8xf32>
    %40 = vector.shape_cast %39 : vector<8xf32> to vector<8x1xf32>
    %41 = tpu.reciprocal %40 {approx = true} : vector<8x1xf32> -> vector<8x1xf32>
    %42 = vector.broadcast %41 : vector<8x1xf32> to vector<8x8xf32>
    %43 = arith.mulf %38, %42 : vector<8x8xf32>
    %44 = arith.truncf %43 : vector<8x8xf32> to vector<8x8xbf16>
    %cst_29 = arith.constant dense<0.000000e+00> : vector<8x8xf32>
    %45 = tpu.matmul %44, %32, %cst_29 {dimension_numbers = #tpu.dot_dimension_numbers<[1], [0], [0], [1], [0, 0, 1, 1], [], []>} : vector<8x8xbf16>, vector<8x8xbf16>, vector<8x8xf32> -> vector<8x8xf32>
    %46 = arith.truncf %45 : vector<8x8xf32> to vector<8x8xbf16>
    %c0_30 = arith.constant 0 : index
    %c8_31 = arith.constant 8 : index
    %47 = vector.load %arg17[%c0_30, %c8_31] : memref<8x32xbf16, #tpu.memory_space<vmem>>, vector<8x8xbf16>
    tpu.vector_store %arg17[%c0_30, %c8_31], %46 {strides = array<i32>} : memref<8x32xbf16, #tpu.memory_space<vmem>>, vector<8x8xbf16>,
    %c0_32 = arith.constant 0 : index
    %c16 = arith.constant 16 : index
    %48 = vector.load %arg14[%c0_32, %c16] : memref<8x32xbf16, #tpu.memory_space<vmem>>, vector<8x8xbf16>
    %c0_33 = arith.constant 0 : index
    %c16_34 = arith.constant 16 : index
    %49 = vector.load %arg15[%c0_33, %c16_34] : memref<8x32xbf16, #tpu.memory_space<vmem>>, vector<8x8xbf16>
    %c0_35 = arith.constant 0 : index
    %c16_36 = arith.constant 16 : index
    %50 = vector.load %arg16[%c0_35, %c16_36] : memref<8x32xbf16, #tpu.memory_space<vmem>>, vector<8x8xbf16>
    %cst_37 = arith.constant dense<0.000000e+00> : vector<8x8xf32>
    %51 = tpu.matmul %48, %49, %cst_37 {dimension_numbers = #tpu.dot_dimension_numbers<[1], [1], [0], [0], [0, 0, 1, 0], [], []>} : vector<8x8xbf16>, vector<8x8xbf16>, vector<8x8xf32> -> vector<8x8xf32>
    %cst_38 = arith.constant dense<0xFF800000> : vector<8xf32>
    %52 = vector.multi_reduction <maximumf>, %51, %cst_38 [1] : vector<8x8xf32> to vector<8xf32>
    %53 = vector.shape_cast %52 : vector<8xf32> to vector<8x1xf32>
    %54 = vector.broadcast %53 : vector<8x1xf32> to vector<8x8xf32>
    %55 = arith.subf %51, %54 : vector<8x8xf32>
    %56 = math.exp %55 : vector<8x8xf32>
    %cst_39 = arith.constant dense<0.000000e+00> : vector<8xf32>
    %57 = vector.multi_reduction <add>, %56, %cst_39 [1] : vector<8x8xf32> to vector<8xf32>
    %58 = vector.shape_cast %57 : vector<8xf32> to vector<8x1xf32>
    %59 = tpu.reciprocal %58 {approx = true} : vector<8x1xf32> -> vector<8x1xf32>
    %60 = vector.broadcast %59 : vector<8x1xf32> to vector<8x8xf32>
    %61 = arith.mulf %56, %60 : vector<8x8xf32>
    %62 = arith.truncf %61 : vector<8x8xf32> to vector<8x8xbf16>
    %cst_40 = arith.constant dense<0.000000e+00> : vector<8x8xf32>
    %63 = tpu.matmul %62, %50, %cst_40 {dimension_numbers = #tpu.dot_dimension_numbers<[1], [0], [0], [1], [0, 0, 1, 1], [], []>} : vector<8x8xbf16>, vector<8x8xbf16>, vector<8x8xf32> -> vector<8x8xf32>
    %64 = arith.truncf %63 : vector<8x8xf32> to vector<8x8xbf16>
    %c0_41 = arith.constant 0 : index
    %c16_42 = arith.constant 16 : index
    %65 = vector.load %arg17[%c0_41, %c16_42] : memref<8x32xbf16, #tpu.memory_space<vmem>>, vector<8x8xbf16>
    tpu.vector_store %arg17[%c0_41, %c16_42], %64 {strides = array<i32>} : memref<8x32xbf16, #tpu.memory_space<vmem>>, vector<8x8xbf16>,
    %c0_43 = arith.constant 0 : index
    %c24 = arith.constant 24 : index
    %66 = vector.load %arg14[%c0_43, %c24] : memref<8x32xbf16, #tpu.memory_space<vmem>>, vector<8x8xbf16>
    %c0_44 = arith.constant 0 : index
    %c24_45 = arith.constant 24 : index
    %67 = vector.load %arg15[%c0_44, %c24_45] : memref<8x32xbf16, #tpu.memory_space<vmem>>, vector<8x8xbf16>
    %c0_46 = arith.constant 0 : index
    %c24_47 = arith.constant 24 : index
    %68 = vector.load %arg16[%c0_46, %c24_47] : memref<8x32xbf16, #tpu.memory_space<vmem>>, vector<8x8xbf16>
    %cst_48 = arith.constant dense<0.000000e+00> : vector<8x8xf32>
    %69 = tpu.matmul %66, %67, %cst_48 {dimension_numbers = #tpu.dot_dimension_numbers<[1], [1], [0], [0], [0, 0, 1, 0], [], []>} : vector<8x8xbf16>, vector<8x8xbf16>, vector<8x8xf32> -> vector<8x8xf32>
    %cst_49 = arith.constant dense<0xFF800000> : vector<8xf32>
    %70 = vector.multi_reduction <maximumf>, %69, %cst_49 [1] : vector<8x8xf32> to vector<8xf32>
    %71 = vector.shape_cast %70 : vector<8xf32> to vector<8x1xf32>
    %72 = vector.broadcast %71 : vector<8x1xf32> to vector<8x8xf32>
    %73 = arith.subf %69, %72 : vector<8x8xf32>
    %74 = math.exp %73 : vector<8x8xf32>
    %cst_50 = arith.constant dense<0.000000e+00> : vector<8xf32>
    %75 = vector.multi_reduction <add>, %74, %cst_50 [1] : vector<8x8xf32> to vector<8xf32>
    %76 = vector.shape_cast %75 : vector<8xf32> to vector<8x1xf32>
    %77 = tpu.reciprocal %76 {approx = true} : vector<8x1xf32> -> vector<8x1xf32>
    %78 = vector.broadcast %77 : vector<8x1xf32> to vector<8x8xf32>
    %79 = arith.mulf %74, %78 : vector<8x8xf32>
    %80 = arith.truncf %79 : vector<8x8xf32> to vector<8x8xbf16>
    %cst_51 = arith.constant dense<0.000000e+00> : vector<8x8xf32>
    %81 = tpu.matmul %80, %68, %cst_51 {dimension_numbers = #tpu.dot_dimension_numbers<[1], [0], [0], [1], [0, 0, 1, 1], [], []>} : vector<8x8xbf16>, vector<8x8xbf16>, vector<8x8xf32> -> vector<8x8xf32>
    %82 = arith.truncf %81 : vector<8x8xf32> to vector<8x8xbf16>
    %c0_52 = arith.constant 0 : index
    %c24_53 = arith.constant 24 : index
    %83 = vector.load %arg17[%c0_52, %c24_53] : memref<8x32xbf16, #tpu.memory_space<vmem>>, vector<8x8xbf16>
    tpu.vector_store %arg17[%c0_52, %c24_53], %82 {strides = array<i32>} : memref<8x32xbf16, #tpu.memory_space<vmem>>, vector<8x8xbf16>,
    %c0_54 = arith.constant 0 : index
    %c0_55 = arith.constant 0 : index
    %84 = vector.load %arg17[%c0_54, %c0_55] : memref<8x32xbf16, #tpu.memory_space<vmem>>, vector<8x32xbf16>
    %c0_56 = arith.constant 0 : index
    %c0_57 = arith.constant 0 : index
    %85 = vector.load %arg11[%c0_56, %c0_57] : memref<32x32xbf16, #tpu.memory_space<vmem>>, vector<32x32xbf16>
    %cst_58 = arith.constant dense<0.000000e+00> : vector<8x32xf32>
    %86 = tpu.matmul %84, %85, %cst_58 {dimension_numbers = #tpu.dot_dimension_numbers<[1], [0], [0], [1], [0, 0, 1, 1], [], []>} : vector<8x32xbf16>, vector<32x32xbf16>, vector<8x32xf32> -> vector<8x32xf32>
    %c0_59 = arith.constant 0 : index
    %c0_60 = arith.constant 0 : index
    %87 = vector.load %arg12[%c0_59, %c0_60] : memref<1x32xf32, #tpu.memory_space<vmem>>, vector<1x32xf32>
    %88 = vector.broadcast %87 : vector<1x32xf32> to vector<8x32xf32>
    %89 = arith.addf %86, %88 : vector<8x32xf32>
    %c0_61 = arith.constant 0 : index
    %c0_62 = arith.constant 0 : index
    %c0_63 = arith.constant 0 : index
    %90 = vector.load %arg13[%c0_61, %c0_62, %c0_63] : memref<1x8x32xf32, #tpu.memory_space<vmem>>, vector<1x8x32xf32>
    %91 = vector.shape_cast %90 : vector<1x8x32xf32> to vector<8x32xf32>
    %92 = vector.shape_cast %89 : vector<8x32xf32> to vector<1x8x32xf32>
    tpu.vector_store %arg13[%c0_61, %c0_62, %c0_63], %92 {strides = array<i32>} : memref<1x8x32xf32, #tpu.memory_space<vmem>>, vector<1x8x32xf32>,
    return
  }
  func.func @transform_0(%arg0: i32, %arg1: i32) -> (i32, i32, i32) {
    %c0_i32 = arith.constant 0 : i32
    %c0_i32_0 = arith.constant 0 : i32
    return %arg0, %arg1, %c0_i32 : i32, i32, i32
  }
  func.func @transform_1(%arg0: i32, %arg1: i32) -> (i32, i32, i32) {
    %c0_i32 = arith.constant 0 : i32
    %c0_i32_0 = arith.constant 0 : i32
    %c0_i32_1 = arith.constant 0 : i32
    return %arg0, %c0_i32, %c0_i32_0 : i32, i32, i32
  }
  func.func @transform_2(%arg0: i32, %arg1: i32) -> (i32, i32, i32) {
    %c0_i32 = arith.constant 0 : i32
    %c0_i32_0 = arith.constant 0 : i32
    %c0_i32_1 = arith.constant 0 : i32
    return %arg0, %c0_i32, %c0_i32_0 : i32, i32, i32
  }
  func.func @transform_3(%arg0: i32, %arg1: i32) -> (i32, i32) {
    %c0_i32 = arith.constant 0 : i32
    %c0_i32_0 = arith.constant 0 : i32
    %c0_i32_1 = arith.constant 0 : i32
    return %c0_i32, %c0_i32_0 : i32, i32
  }
  func.func @transform_4(%arg0: i32, %arg1: i32) -> (i32, i32) {
    %c0_i32 = arith.constant 0 : i32
    %c0_i32_0 = arith.constant 0 : i32
    %c0_i32_1 = arith.constant 0 : i32
    return %c0_i32, %c0_i32_0 : i32, i32
  }
  func.func @transform_5(%arg0: i32, %arg1: i32) -> (i32, i32) {
    %c0_i32 = arith.constant 0 : i32
    %c0_i32_0 = arith.constant 0 : i32
    %c0_i32_1 = arith.constant 0 : i32
    return %c0_i32, %c0_i32_0 : i32, i32
  }
  func.func @transform_6(%arg0: i32, %arg1: i32) -> (i32, i32) {
    %c0_i32 = arith.constant 0 : i32
    %c0_i32_0 = arith.constant 0 : i32
    %c0_i32_1 = arith.constant 0 : i32
    return %c0_i32, %c0_i32_0 : i32, i32
  }
  func.func @transform_7(%arg0: i32, %arg1: i32) -> (i32, i32) {
    %c0_i32 = arith.constant 0 : i32
    %c0_i32_0 = arith.constant 0 : i32
    %c0_i32_1 = arith.constant 0 : i32
    return %c0_i32, %c0_i32_0 : i32, i32
  }
  func.func @transform_8(%arg0: i32, %arg1: i32) -> (i32, i32) {
    %c0_i32 = arith.constant 0 : i32
    %c0_i32_0 = arith.constant 0 : i32
    %c0_i32_1 = arith.constant 0 : i32
    return %c0_i32, %c0_i32_0 : i32, i32
  }
  func.func @transform_9(%arg0: i32, %arg1: i32) -> (i32, i32) {
    %c0_i32 = arith.constant 0 : i32
    %c0_i32_0 = arith.constant 0 : i32
    %c0_i32_1 = arith.constant 0 : i32
    return %c0_i32, %c0_i32_0 : i32, i32
  }
  func.func @transform_10(%arg0: i32, %arg1: i32) -> (i32, i32) {
    %c0_i32 = arith.constant 0 : i32
    %c0_i32_0 = arith.constant 0 : i32
    %c0_i32_1 = arith.constant 0 : i32
    return %c0_i32, %c0_i32_0 : i32, i32
  }
  func.func @transform_11(%arg0: i32, %arg1: i32) -> (i32, i32, i32) {
    %c0_i32 = arith.constant 0 : i32
    %c0_i32_0 = arith.constant 0 : i32
    return %arg0, %arg1, %c0_i32 : i32, i32, i32
  }
}

</mosaic_0001>

<bundles_post_ra>
// kernel: tpu_custom_call.1
= control target key start
LH: loop header
LB: loop body
LE: loop exit
PB: predicated region body
PF: predicated region fallthrough
CT: control target
= control target key end

     0   :  { %s2062_s0 = inlined_call_operand.hbm [shape: bf16[2,8,32], index: 0, kind: input, shape index: {}]   ;;  %s2063_s1 = inlined_call_operand.hbm [shape: bf16[2,8,32], index: 1, kind: input, shape index: {}]   ;;  %s2064_s2 = inlined_call_operand.hbm [shape: bf16[2,8,32], index: 2, kind: input, shape index: {}]   ;;  %s2065_s3 = inlined_call_operand.hbm [shape: bf16[32,32], index: 3, kind: input, shape index: {}]   ;;  %s2066_s4 = inlined_call_operand.vmem [shape: f32[1,32], index: 4, kind: input, shape index: {}]   ;;  %s2067_s5 = inlined_call_operand.hbm [shape: bf16[32,32], index: 5, kind: input, shape index: {}]   ;;  %s2068_s6 = inlined_call_operand.vmem [shape: f32[1,32], index: 6, kind: input, shape index: {}]   ;;  %s2069_s7 = inlined_call_operand.hbm [shape: bf16[32,32], index: 7, kind: input, shape index: {}]   ;;  %s2070_s8 = inlined_call_operand.vmem [shape: f32[1,32], index: 8, kind: input, shape index: {}]   ;;  %s2071_s9 = inlined_call_operand.hbm [shape: bf16[32,32], index: 9, kind: input, shape index: {}]   ;;  %s2072_s10 = inlined_call_operand.vmem [shape: f32[1,32], index: 10, kind: input, shape index: {}]   ;;  %s2073_s11 = inlined_call_operand.hbm [shape: f32[2,8,32], index: 11, kind: output, shape index: {}]  }
   0x1   :  { %2087 = sst [smem:[#allocation31_spill]] %s2062_s0 }
   0x2   :  { %2088 = sst [smem:[#allocation32_spill]] %s2063_s1 }
   0x3   :  { %2089 = sst [smem:[#allocation33_spill]] %s2065_s3 }
   0x4   :  { %2090 = sst [smem:[#allocation34_spill]] %s2067_s5 }
   0x5   :  { %2091 = sst [smem:[#allocation35_spill]] %s2069_s7 }
   0x6   :  { %2092 = sst [smem:[#allocation36_spill]] %s2071_s9 }
   0x7   :  { %2093 = sst [smem:[#allocation37_spill]] %s2072_s10 }
   0x8   :  { %16 = vsyncpa [#allocation7], 0 }
   0x9   :  { %18 = vsyncpa [#allocation7 + $0x1], 0 }
   0xa   :  { %19 = vsyncpa [#allocation10], 0 }
   0xb   :  { %21 = vsyncpa [#allocation10 + $0x1], 0 }
   0xc   :  { %22 = vsyncpa [#allocation13], 0 }
   0xd   :  { %23 = vsyncpa [#allocation16], 0 }
   0xe   :  { %24 = vsyncpa [#allocation8], 0 }
   0xf   :  { %26 = vsyncpa [#allocation8 + $0x1], 0  ;;  %s1785_s17 = smov 0   ;;  %s1787_s18 = smov 0  }
  0x10   :  { %s1789_s19 = smov 0   ;;  %s1791_s20 = smov 0  }
  0x11   :  { %s1793_s21 = smov 0   ;;  %s1795_s22 = smov 0  }
  0x12 LB: > { %2094 = sst [smem:[#allocation24_spill]] %s1691_s17  ;;  %s1816_s23 = sadd.s32 4294967295, %s1711_s22   ;;  %s1711_s22 = sphi %s1795_s22, %s32_s22   ;;  %s1707_s21 = sphi %s1793_s21, %s2124_s21   ;;  %s1703_s20 = sphi %s1791_s20, %s2123_s20   ;;  %s1699_s19 = sphi %s1789_s19, %s2127_s19   ;;  %s1695_s18 = sphi %s1787_s18, %s2126_s18   ;;  %s1691_s17 = sphi %s1785_s17, %s2125_s17  }
  0x13   : > { %2095 = sst [smem:[#allocation25_spill]] %s1707_s21  ;;  %p1189_p0 = scmp.ge.s32.totalorder %s1711_s22, 1 }
  0x14   : > { %2096 = sst [smem:[#allocation26_spill]] %s1711_s22  ;;  %p67_p1 = scmp.eq.s32.totalorder %s1816_s23, 0 }
  0x15   : > { %p325_p2 = scmp.lt.s32.totalorder %s1711_s22, 3  ;;  %s2097_s3 = sld [smem:[#allocation33_spill]] }
  0x16   : > { %s1713_s28 = smov [#allocation12]   ;;  %p1194_p6 = scmp.ge.s32.totalorder %s1711_s22, 2 }
  0x17   : > { %p1824_p3 = pnand %p1189_p0, %p325_p2  ;;  %s338_s29 = sshll.u32 %s1713_s28, 4  ;;  %s339_s29 = int_to_ptr.vmem [resolvable:$true] %s338_s29 }
  0x18   : > { %s2100_s7 = sld [smem:[#allocation35_spill]]  ;;  %s2074_s15 = smov 64  }
  0x19   : > { %p1290_p4 = pneg %p1824_p3  ;;  %s2076_s16 = smov 4  }
  0x1a   : > { %s1716_s24 = smov [#allocation15]   ;;  %s1188_s28 = sadd.s32 4294967294, %s1711_s22  }
  0x1b   : > { %s336_s26 = sshll.u32 %s2097_s3, 4  ;;  %p1832_p5 = pnand %p1290_p4, %p67_p1  ;;  %s337_s26 = int_to_ptr.hbm [resolvable:$true] %s336_s26 }
  0x1c   : > { %s372_s25 = sshll.u32 %s1716_s24, 4  ;;  %s44_s12 = sadd.s32 1, %s1707_s21  ;;  %s373_s25 = int_to_ptr.vmem [resolvable:$true] %s372_s25 }
  0x1d   : > { %1293 = dma.hbm_to_vmem [thread:$0]  (!%p1832_p5), %s337_s26, 256, %s339_s29, [#allocation13], %s2074_s15, %s2074_s15, %s2076_s16  }
  0x1e   : > { %s370_s14 = sshll.u32 %s2100_s7, 4  ;;  %p46_p7 = scmp.ge.s32.totalorder %s44_s12, 2  ;;  %s371_s14 = int_to_ptr.hbm [resolvable:$true] %s370_s14 }
  0x1f   : > { %1299 = dma.hbm_to_vmem [thread:$0]  (!%p1832_p5), %s371_s14, 256, %s373_s25, [#allocation16], %s2074_s15, %s2074_s15, %s2076_s16  }
  0x20   : > { %s53_s13 = sadd.s32 1, %s1699_s19  ;;  %p60_p8 = scmp.ne.s32.totalorder %s1699_s19, %s1695_s18 }
  0x21   : > { %p61_p9 = scmp.eq.s32.totalorder %s1711_s22, 0  ;;  %s2129_s12 = smov (%p46_p7, %s44_s12), 0 }
  0x22   : > { %2101 = sst [smem:[#allocation27_spill]] %s2129_s12  ;;  %p66_p11 = scmp.ne.s32.totalorder %s1695_s18, %s1691_s17 }
  0x23   : > { %p1858_p10 = por %p61_p9, %p60_p8  ;;  %s48_s29 = ssub.s32 %s1707_s21, %s2129_s12 }
  0x24   : > { %p312_p12 = scmp.eq.s32.totalorder %s1816_s23, 1  ;;  %p51_p13 = scmp.eq.s32.totalorder %s48_s29, 0 }
  0x25   : > { %p1869_p0 = por %p67_p1, %p66_p11  ;;  %p318_p4 = scmp.eq.s32.totalorder %s1188_s28, 1 }
  0x26   : > { %p1873_p2 = por %p312_p12, %p60_p8  ;;  %p1321_p9 = scmp.lt.s32.totalorder %s1711_s22, 2 }
  0x27   : > { %s1878_s25 = scalar_select %p51_p13, %s1699_s19, %s53_s13  }
  0x28   : > { %s2104_s24 = scalar_select %p1873_p2, 1, 0 }
  0x29   : > { %2106 = sst [smem:[#allocation29_spill]] %s1878_s25  ;;  %p1880_p7 = por %p318_p4, %p66_p11 }
  0x2a   : > { %2105 = sst [smem:[#allocation28_spill]] %s2104_s24  ;;  %s2082_s16 = sand.u32 1, %s1699_s19  }
  0x2b   : > { %s2107_s15 = scalar_select %p1880_p7, 1, 0 }
  0x2c   : > { %s1887_s3 = sshll.u32 %s1707_s21, 2  ;;  %s1891_s29 = sshll.u32 %s2082_s16, 2 }
  0x2d   : > { %2108 = sst [smem:[#allocation30_spill]] %s2107_s15  ;;  %p1895_p8 = pnand %p1321_p9, %p1858_p10 }
  0x2e   : > { %s426_s28 = sand.u32 1, %s1711_s22   ;;  %s2110_s1 = sld [smem:[#allocation32_spill]] }
  0x2f   : > { %s430_s15 = scalar_lea.vmem [#allocation9], %s1891_s29  ;;  %s2111_s5 = sld [smem:[#allocation34_spill]] }
  0x30   : > { %s438_s21 = sshll.u32 %s430_s15, 4  ;;  %s427_s24 = scalar_lea.sflag [#allocation10], %s426_s28  ;;  %s439_s21 = int_to_ptr.vmem [resolvable:$true] %s438_s21 }
  0x31   : > { %s1717_s22 = smov [#allocation14]   ;;  %s2112_s9 = sld [smem:[#allocation36_spill]] }
  0x32   : > { %s355_s12 = sshll.u32 %s1717_s22, 4  ;;  %s2114_s16 = smov 64   ;;  %s356_s12 = int_to_ptr.vmem [resolvable:$true] %s355_s12 }
  0x33   : > { %s1718_s28 = smov [#allocation17]   ;;  %s2115_s0 = sld [smem:[#allocation31_spill]] }
  0x34   : > { %s434_s25 = scalar_lea.hbm %s2110_s1, %s1887_s3  ;;  %s410_s13 = scalar_lea.vmem [#allocation6], %s1891_s29 }
  0x35   : > { %s436_s17 = sshll.u32 %s434_s25, 4  ;;  %s353_s10 = sshll.u32 %s2111_s5, 4  ;;  %s437_s17 = int_to_ptr.hbm [resolvable:$true] %s436_s17  ;;  %s354_s10 = int_to_ptr.hbm [resolvable:$true] %s353_s10 }
  0x36   : > { %1309 = dma.hbm_to_vmem [thread:$0]  (!%p1895_p8), %s437_s17, 64, %s439_s21, %s427_s24  }
  0x37   : > { %s387_s15 = sshll.u32 %s2112_s9, 4  ;;  %s2113_s25 = smov 4   ;;  %s388_s15 = int_to_ptr.hbm [resolvable:$true] %s387_s15 }
  0x38   : > { %1296 = dma.hbm_to_vmem [thread:$0]  (!%p1832_p5), %s354_s10, 256, %s356_s12, [#allocation13], %s2114_s16, %s2114_s16, %s2113_s25  }
  0x39   : > { %s389_s17 = sshll.u32 %s1718_s28, 4  ;;  %s415_s22 = scalar_lea.hbm %s2115_s0, %s1887_s3  ;;  %s390_s17 = int_to_ptr.vmem [resolvable:$true] %s389_s17 }
  0x3a   : > { %1302 = dma.hbm_to_vmem [thread:$0]  (!%p1832_p5), %s388_s15, 256, %s390_s17, [#allocation16], %s2114_s16, %s2114_s16, %s2113_s25  }
  0x3b   : > { %s417_s1 = sshll.u32 %s415_s22, 4  ;;  %s419_s5 = sshll.u32 %s410_s13, 4  ;;  %s418_s1 = int_to_ptr.hbm [resolvable:$true] %s417_s1  ;;  %s420_s5 = int_to_ptr.vmem [resolvable:$true] %s419_s5 }
  0x3c   : > { %s2116_s9 = sand.u32 1, %s1699_s19   ;;  %s453_s21 = scalar_lea.hbm %s2064_s2, %s1887_s3 }
  0x3d   : > { %s407_s10 = scalar_lea.sflag [#allocation7], %s2116_s9  ;;  %s455_s26 = sshll.u32 %s453_s21, 4  ;;  %s456_s26 = int_to_ptr.hbm [resolvable:$true] %s455_s26 }
  0x3e   : > { %1306 = dma.hbm_to_vmem [thread:$0]  (!%p1895_p8), %s418_s1, 64, %s420_s5, %s407_s10  }
  0x3f   : > { %s449_s0 = scalar_lea.vmem [#allocation11], %s1891_s29  ;;  %466 = sbr.rel (%p1824_p3) target bundleno = 1166 (0x48e), region = 64 }
  0x40   : > { %s457_s30 = sshll.u32 %s449_s0, 4  ;;  %s1942_s15 = sand.u32 (!%p1824_p3), 1, %s1695_s18   ;;  %s458_s30 = int_to_ptr.vmem [resolvable:$true] %s457_s30 }
  0x41   : > { %1312 = dma.hbm_to_vmem [thread:$0]  (!%p1895_p8), %s456_s26, 64, %s458_s30, %s427_s24  }
  0x42   : > { %s1945_s5 = sshll.u32 (!%p1824_p3), %s1942_s15, 2  ;;  %s469_s3 = scalar_lea.sflag (!%p1824_p3), [#allocation7], %s1942_s15 }
  0x43   : > { %s472_s9 = scalar_lea.vmem (!%p1824_p3), [#allocation6], %s1945_s5 }
  0x44   : > { %1670 = dma.done.wait (%p1869_p0), %s469_s3, 64  }
  0x45   : > { %1672 = vsyncadd (%p1869_p0), %s469_s3, 4294967232  ;;  %s478_s0 = sand.u32 1, %s1816_s23   ;;  %s482_s27 = scalar_lea.vmem [#allocation9], %s1945_s5 }
  0x46   : > { %s479_s7 = scalar_lea.sflag [#allocation10], %s478_s0 }
  0x47   : > { %1674 = dma.done.wait (%p1869_p0), %s479_s7, 128  }
  0x48   : > { %1676 = vsyncadd (%p1869_p0), %s479_s7, 4294967168  ;;  %s492_s24 = scalar_lea.vmem [#allocation11], %s1945_s5 }
  0x49   : > { %1678 = dma.done.wait (%p67_p1), [#allocation13], 512  }
  0x4a   : > { %1680 = vsyncadd (%p67_p1), [#allocation13], 4294966784 }
  0x4b   : > { %1682 = dma.done.wait (%p67_p1), [#allocation16], 512  }
  0x4c   : > { %1684 = vsyncadd (%p67_p1), [#allocation16], 4294966784  ;;  %v1259_v0 = vld [vmem:[#allocation14 + $0x8] sm:$0xff]  ;;  %v1263_v1 = vld [vmem:[#allocation12 + $0x8] sm:$0xff]  ;;  %vm588_vm0 = vcmask 261120   ;;  %vm606_vm1 = vcmask 257024  }
  0x4d   : > { %v1258_v2 = vld [vmem:[#allocation14] sm:$0xff]  ;;  %598 = vmatpush.bf16.msra.mxu0 %v1259_v0  ;;  %678 = vmatpush.bf16.msra.mxu2 %v1263_v1  ;;  %v1262_v3 = vld [vmem:[#allocation12] sm:$0xff]  ;;  %v647_v5 = vld [vmem:[%s472_s9] sm:$0xf]  ;;  %vm691_vm2 = vcmask 64512   ;;  %s1719_s16 = smov 112  }
  0x4e   : > { %v567_v4 = vld [vmem:[%s482_s27] sm:$0xf]  ;;  %v1387_v6 = vld [vmem:[%s2068_s6] ss:$0 sm:$0xff]  ;;  %v1261_v7 = vld [vmem:[#allocation15 + $0x8] sm:$0xff]  ;;  %s1720_s17 = smov 120  }
  0x4f   : > { %638 = vmatpush.bf16.msra.mxu1 %v1261_v7  ;;  %v1388_v11 = vld [vmem:[%s2066_s4] ss:$0 sm:$0xff]  ;;  %s1721_s22 = smov 104   ;;  %v1260_v38 = vld [vmem:[#allocation15] sm:$0xff]  ;;  %vm726_vm3 = vcmask 1043456   ;;  %vm744_vm4 = vcmask 60416  }
  0x50   : > { %v608_v39 = vld [vmem:[%s492_s24] sm:$0xf]  ;;  %s1722_s10 = smov 8   ;;  %s1723_s12 = smov 24   ;;  %vm819_vm5 = vcmask 126016   ;;  %vm894_vm6 = vcmask 191616  }
  0x51   : > { %599 = vmatpush.bf16.msra.mxu0 %v1258_v2  ;;  %679 = vmatpush.bf16.msra.mxu2 %v1262_v3  ;;  %v1389_v52 = vld [vmem:[%s2070_s8] ss:$0 sm:$0xff]  ;;  %s1724_s28 = smov 16   ;;  %vm969_vm7 = vcmask 257216   ;;  %s1255_s21 = sshll.u32 %s1703_s20, 3 }
  0x52   : > { %s1209_s26 = sshll.u32 %s1942_s15, 3  ;;  %s1021_s9 = scalar_lea.hbm %s2073_s11, %s1255_s21 }
  0x53   : > { %639 = vmatpush.bf16.msra.mxu1 %v1260_v38  ;;  %s2118_s27 = sld [smem:[#allocation37_spill]]  ;;  %s561_s24 = scalar_lea.vmem [#allocation18], %s1209_s26 }
  0x54   : > { %1218 = vmatmul.msk.bf16.vlgmr.msra.gmra.mxu0 %vm588_vm0, %v567_v4  ;;  %1236 = vmatmul.msk.bf16.vlgmr.msra.gmra.mxu2 %vm588_vm0, %v647_v5  ;;  %s1023_s14 = sshll.u32 %s561_s24, 4  ;;  %s1025_s29 = sshll.u32 %s1021_s9, 4  ;;  %s1024_s14 = int_to_ptr.vmem [resolvable:$true] %s1023_s14  ;;  %s1026_s29 = int_to_ptr.hbm [resolvable:$true] %s1025_s29 }
  0x55   : > { %s1010_s20 = scalar_lea.sflag [#allocation8], %s1942_s15  ;;  %s1631_s23 = sshra.s32 %s1026_s29, 4  ;;  %s1632_s23 = int_to_ptr.hbm [resolvable:$true] %s1631_s23 }
  0x56   : > { %1227 = vmatmul.msk.bf16.vlgmr.msra.gmra.mxu1 %vm588_vm0, %v608_v39  ;;  %s1633_s25 = scalar_lea.hbm %s1632_s23, 8  ;;  %p1638_p10 = scmp.lt.s32.totalorder %s1632_s23, %s2073_s11 }
  0x57   : > { %p1634_p1 = scmp.ne.s32.totalorder %s1632_s23, %s1633_s25 }
  0x59   : > { %p1635_p3 = pnand %p1634_p1, %p1873_p2 }
  0x5b   : > { %p1636_p5 = pneg %p1635_p3 }
  0xd1   : > { %v601_v8 = vpop.f32.mrf.mxu0 }
  0xd2   : > { %v602_v9 = vadd.f32 %v1387_v6, %v601_v8 }
  0xd3   : > { %v641_v53 = vpop.f32.mrf.mxu1 }
  0xd4   : > { %v605_v10 = vpack.c.bf16 %v602_v9, %v602_v9  ;;  %v642_v54 = vadd.f32 %v1389_v52, %v641_v53 }
  0xd6   : > { %607 = vst.msk [vmem:[#allocation3] sm:$0xf] %vm606_vm1, %v605_v10  ;;  %v645_v55 = vpack.c.bf16 %v642_v54, %v642_v54 }
  0xd7   : > { %v681_v12 = vpop.f32.mrf.mxu2 }
  0xd8   : > { %v682_v13 = vadd.f32 %v1388_v11, %v681_v12  ;;  %646 = vst.msk [vmem:[#allocation4] sm:$0xf] %vm606_vm1, %v645_v55 }
  0xd9   : > { %v603_v14 = vpop.f32.mrf.mxu0 }
  0xda   : > { %v685_v15 = vpack.c.bf16 %v682_v13, %v682_v13 }
  0xdb   : > { %v643_v56 = vpop.f32.mrf.mxu1 }
  0xdc   : > { %687 = vst.msk [vmem:[#allocation2] sm:$0xf] %vm606_vm1, %v685_v15 }
  0xdd   : > { %v689_v16 = vld [vmem:[#allocation3] sm:$0xf] }
  0xde   : > { %v822_v17 = vld [vmem:[#allocation3] sm:$0xf]  ;;  %v696_v19 = vsel %vm691_vm2, %v689_v16, 0 }
  0xdf   : > { %v747_v18 = vld [vmem:[#allocation3] sm:$0xf]  ;;  %v830_v20 = vunpack.c.l.b16 %v822_v17  ;;  %v683_v22 = vpop.f32.mrf.mxu2  ;;  %705 = vmatpush.bf16.xpose.msra.mxu3 %v696_v19  ;;  %v690_v57 = vld [vmem:[#allocation4] sm:$0xf] }
  0xe0   : > { %v755_v21 = vunpack.c.l.b16 %v747_v18  ;;  %v897_v25 = vld [vmem:[#allocation3] sm:$0xf]  ;;  %v728_v58 = vsel %vm726_vm3, %v690_v57, 0  ;;  %v748_v9 = vld [vmem:[#allocation4] sm:$0xf] }
  0xe1   : > { %v831_v23 = vpack.c.b16 %v830_v20, %v830_v20  ;;  %v905_v30 = vunpack.c.l.b16 %v897_v25  ;;  %737 = vmatpush.bf16.msrb.mxu0 %v728_v58  ;;  %v791_v10 = vunpack.c.l.b16 %v748_v9  ;;  %v1390_v9 = vld [vmem:[%s2118_s27] ss:$0 sm:$0xff] }
  0xe2   : > { %v756_v24 = vpack.c.b16 %v755_v21, %v755_v21 }
  0xe3   : > { %832 = vrot.lane.b32.xlu1 %v831_v23, %s1719_s16  ;;  %v688_v26 = vld [vmem:[#allocation2] sm:$0xf]  ;;  %v906_v35 = vpack.c.b16 %v905_v30, %v905_v30  ;;  %v792_v11 = vpack.c.b16 %v791_v10, %v791_v10 }
  0xe4   : > { %757 = vrot.lane.b32.xlu0 %v756_v24, %s1720_s17  ;;  %v821_v27 = vld [vmem:[#allocation2] sm:$0xf] }
  0xe5   : > { %v746_v28 = vld [vmem:[#allocation2] sm:$0xf]  ;;  %v825_v29 = vunpack.c.l.b16 %v821_v27 }
  0xe6   : > { %v750_v31 = vunpack.c.l.b16 %v746_v28  ;;  %1237 = vmatmul.msk.bf16.vlgmr.msra.gmra.mxu3 %vm691_vm2, %v688_v26  ;;  %v896_v34 = vld [vmem:[#allocation2] sm:$0xf] }
  0xe7   : > { %v826_v32 = vpack.c.b16 %v825_v29, %v825_v29  ;;  %v900_v36 = vunpack.c.l.b16 %v896_v34 }
  0xe8   : > { %v751_v33 = vpack.c.b16 %v750_v31, %v750_v31 }
  0xe9   : > { %827 = vrot.lane.b32.xlu2 %v826_v32, %s1719_s16  ;;  %v901_v37 = vpack.c.b16 %v900_v36, %v900_v36  ;;  %v823_v36 = vld [vmem:[#allocation4] sm:$0xf] }
  0xeb   : > { %907 = vrot.lane.b32.xlu1 %v906_v35, %s1721_s22 }
  0xec   : > { %752 = vrot.lane.b32.xlu0 %v751_v33, %s1720_s17  ;;  %v898_v33 = vld [vmem:[#allocation4] sm:$0xf] }
  0xed   : > { %v941_v34 = vunpack.c.l.b16 %v898_v33 }
  0xef   : > { %v942_v35 = vpack.c.b16 %v941_v34, %v941_v34 }
  0xf1   : > { %902 = vrot.lane.b32.xlu2 %v901_v37, %s1721_s22  ;;  %v866_v37 = vunpack.c.l.b16 %v823_v36 }
  0xf3   : > { %v867_v38 = vpack.c.b16 %v866_v37, %v866_v37 }
 0x143   : > { %v828_v44 = vpop.permute.xlu2 %827 }
 0x14b   : > { %v903_v50 = vpop.permute.xlu2 %902 }
 0x155   : > { %v833_v40 = vpop.permute.xlu1 %832 }
 0x156   : > { %v758_v41 = vpop.permute.xlu0 %757  ;;  %v838_v43 = vsel %vm691_vm2, %v833_v40, 0 }
 0x157   : > { %v763_v42 = vsel %vm691_vm2, %v758_v41, 0  ;;  %847 = vmatpush.bf16.xpose.msrb.mxu3 %v838_v43 }
 0x158   : > { %772 = vmatpush.bf16.xpose.msrb.mxu1 %v763_v42 }
 0x15d   : > { %v908_v45 = vpop.permute.xlu1 %907 }
 0x15e   : > { %v753_v46 = vpop.permute.xlu0 %752  ;;  %v913_v47 = vsel %vm691_vm2, %v908_v45, 0  ;;  %1241 = vmatmul.msk.bf16.vlgmr.msrb.gmra.mxu3 %vm691_vm2, %v828_v44 }
 0x15f   : > { %1239 = vmatmul.msk.bf16.vlgmr.msrb.gmra.mxu1 %vm691_vm2, %v753_v46 }
 0x160   : > { %922 = vmatpush.bf16.xpose.msra.mxu1 %v913_v47 }
 0x169   : > { %v707_v48 = vpop.f32.mrf.mxu3 }
 0x16a   : > { %v711_v49 = vsel %vm691_vm2, %v707_v48, -inf }
 0x16b   : > { %712 = vmax.xlane.f32.xlu1 %v711_v49 }
 0x16f   : > { %1243 = vmatmul.msk.bf16.vlgmr.msra.gmra.mxu1 %vm691_vm2, %v903_v50 }
 0x171   : > { %v709_v51 = vpop.f32.mrf.mxu3 }
 0x1dc   : > { %v774_v59 = vpop.f32.mrf.mxu1 }
 0x1dd   : > { %v778_v60 = vsel %vm691_vm2, %v774_v59, -inf }
 0x1de   : > { %779 = vmax.xlane.f32.xlu0 %v778_v60  ;;  %v713_v61 = vpop.xlane.xlu1 %712 }
 0x1df   : > { %v714_v62 = vsub.f32 %v707_v48, %v713_v61 }
 0x1e1   : > { %v849_v63 = vpop.f32.mrf.mxu3  ;;  %v715_v0 = vmul.f32 1.442695, %v714_v62 }
 0x1e2   : > { %v853_v8 = vsel %vm691_vm2, %v849_v63, -inf }
 0x1e3   : > { %1391 = vpow2.f32 %v715_v0 }
 0x1e4   : > { %v776_v1 = vpop.f32.mrf.mxu1 }
 0x1e9   : > { %v851_v2 = vpop.f32.mrf.mxu3  ;;  %v1392_v3 = vpop.eup %1391 }
 0x1ea   : > { %v717_v5 = vsel %vm691_vm2, %v1392_v3, 0.0 }
 0x1eb   : > { %718 = vadd.xlane.f32.xlu1 %v717_v5  ;;  %v1264_v5 = vld [vmem:[#allocation17] sm:$0xff] }
 0x1ec   : > { %v924_v4 = vpop.f32.mrf.mxu1 }
 0x1ed   : > { %v928_v6 = vsel %vm691_vm2, %v924_v4, -inf }
 0x1ee   : > { %929 = vmax.xlane.f32.xlu2 %v928_v6 }
 0x1f4   : > { %v926_v7 = vpop.f32.mrf.mxu1 }
 0x1f6   : > { %854 = vmax.xlane.f32.xlu2 %v853_v8 }
 0x20e   : > { %793 = vrot.lane.b32.xlu2 %v792_v11, %s1720_s17 }
 0x251   : > { %v780_v12 = vpop.xlane.xlu0 %779 }
 0x252   : > { %v781_v13 = vsub.f32 %v774_v59, %v780_v12 }
 0x254   : > { %v782_v14 = vmul.f32 1.442695, %v781_v13 }
 0x256   : > { %1393 = vpow2.f32 %v782_v14 }
 0x25c   : > { %v1394_v15 = vpop.eup %1393 }
 0x25d   : > { %v784_v16 = vsel %vm691_vm2, %v1394_v15, 0.0 }
 0x25e   : > { %785 = vadd.xlane.f32.xlu0 %v784_v16  ;;  %v719_v17 = vpop.xlane.xlu1 %718 }
 0x25f   : > { %1395 = vrcp.f32 %v719_v17 }
 0x261   : > { %v930_v18 = vpop.xlane.xlu2 %929 }
 0x262   : > { %v931_v19 = vsub.f32 %v924_v4, %v930_v18  ;;  %v1265_v4 = vld [vmem:[#allocation17 + $0x8] sm:$0xff] }
 0x263   : > { %1001 = vmatpush.bf16.msra.mxu3 %v1265_v4 }
 0x264   : > { %v932_v20 = vmul.f32 1.442695, %v931_v19 }
 0x265   : > { %v1396_v21 = vpop.eup %1395 }
 0x266   : > { %1397 = vpow2.f32 %v932_v20  ;;  %v721_v22 = vmul.f32 %v1396_v21, %v1392_v3 }
 0x267   : > { %1002 = vmatpush.bf16.msra.mxu3 %v1264_v5 }
 0x268   : > { %v722_v25 = vpack.c.bf16 %v721_v22, %v721_v22 }
 0x269   : > { %v855_v23 = vpop.xlane.xlu2 %854 }
 0x26a   : > { %v856_v24 = vsub.f32 %v849_v63, %v855_v23  ;;  %1238 = vmatmul.msk.bf16.vlgmr.msrb.gmra.mxu0 %vm691_vm2, %v722_v25 }
 0x26c   : > { %v1398_v26 = vpop.eup %1397  ;;  %v857_v27 = vmul.f32 1.442695, %v856_v24 }
 0x26d   : > { %v934_v28 = vsel %vm691_vm2, %v1398_v26, 0.0 }
 0x26e   : > { %1399 = vpow2.f32 %v857_v27  ;;  %935 = vadd.xlane.f32.xlu0 %v934_v28 }
 0x271   : > { %v794_v29 = vpop.permute.xlu2 %793 }
 0x272   : > { %v799_v30 = vsel %vm726_vm3, %v794_v29, 0 }
 0x273   : > { %808 = vmatpush.bf16.msrb.mxu2 %v799_v30 }
 0x274   : > { %v1400_v31 = vpop.eup %1399 }
 0x275   : > { %v859_v32 = vsel %vm691_vm2, %v1400_v31, 0.0 }
 0x276   : > { %860 = vadd.xlane.f32.xlu1 %v859_v32 }
 0x282   : > { %943 = vrot.lane.b32.xlu0 %v942_v35, %s1721_s22  ;;  %s1637_s22 = scalar_lea.hbm %s2073_s11, 16 }
 0x283   : > { %p1639_p11 = scmp.lt.s32.totalorder %s1637_s22, %s1633_s25 }
 0x285   : > { %p1640_p12 = por %p1639_p11, %p1638_p10 }
 0x287   : > { %p1641_p13 = pnand %p1640_p12, %p1636_p5 }
 0x28f   : > { %868 = vrot.lane.b32.xlu1 %v867_v38, %s1719_s16 }
 0x2d1   : > { %v786_v39 = vpop.xlane.xlu0 %785 }
 0x2d2   : > { %1401 = vrcp.f32 %v786_v39 }
 0x2d8   : > { %v1402_v40 = vpop.eup %1401 }
 0x2d9   : > { %v788_v41 = vmul.f32 %v1402_v40, %v1394_v15 }
 0x2db   : > { %v789_v42 = vpack.c.bf16 %v788_v41, %v788_v41 }
 0x2dd   : > { %1240 = vmatmul.msk.bf16.vlgmr.msrb.gmra.mxu2 %vm691_vm2, %v789_v42 }
 0x2e1   : > { %v936_v43 = vpop.xlane.xlu0 %935 }
 0x2e2   : > { %1403 = vrcp.f32 %v936_v43 }
 0x2e7   : > { %v739_v44 = vpop.f32.mrf.mxu0 }
 0x2e8   : > { %v743_v45 = vpack.c.bf16 %v739_v44, %v739_v44  ;;  %v1404_v46 = vpop.eup %1403 }
 0x2e9   : > { %v938_v48 = vmul.f32 %v1404_v46, %v1398_v26  ;;  %v861_v49 = vpop.xlane.xlu1 %860 }
 0x2ea   : > { %745 = vst.msk [vmem:[#allocation5] sm:$0xf] %vm744_vm4, %v743_v45  ;;  %1405 = vrcp.f32 %v861_v49 }
 0x2eb   : > { %v939_v52 = vpack.c.bf16 %v938_v48, %v938_v48 }
 0x2ef   : > { %v741_v47 = vpop.f32.mrf.mxu0 }
 0x2f0   : > { %v1406_v53 = vpop.eup %1405 }
 0x2f1   : > { %v863_v54 = vmul.f32 %v1406_v53, %v1400_v31 }
 0x2f3   : > { %v864_v57 = vpack.c.bf16 %v863_v54, %v863_v54 }
 0x2f4   : > { %v944_v50 = vpop.permute.xlu0 %943 }
 0x2f5   : > { %v949_v51 = vsel %vm726_vm3, %v944_v50, 0 }
 0x2f6   : > { %958 = vmatpush.bf16.msra.mxu2 %v949_v51 }
 0x2f9   : > { %1244 = vmatmul.msk.bf16.vlgmr.msra.gmra.mxu2 %vm691_vm2, %v939_v52 }
 0x301   : > { %v869_v55 = vpop.permute.xlu1 %868 }
 0x302   : > { %v874_v56 = vsel %vm726_vm3, %v869_v55, 0 }
 0x303   : > { %883 = vmatpush.bf16.msra.mxu0 %v874_v56 }
 0x306   : > { %1242 = vmatmul.msk.bf16.vlgmr.msra.gmra.mxu0 %vm691_vm2, %v864_v57 }
 0x360   : > { %v810_v58 = vpop.f32.mrf.mxu2 }
 0x361   : > { %v814_v59 = vpack.c.bf16 %v810_v58, %v810_v58 }
 0x363   : > { %816 = vrot.lane.b32.xlu2 %v814_v59, %s1722_s10 }
 0x368   : > { %v812_v60 = vpop.f32.mrf.mxu2 }
 0x37c   : > { %v960_v61 = vpop.f32.mrf.mxu2 }
 0x37d   : > { %v964_v62 = vpack.c.bf16 %v960_v61, %v960_v61 }
 0x37f   : > { %966 = vrot.lane.b32.xlu2 %v964_v62, %s1723_s12 }
 0x383   : > { %v885_v63 = vpop.f32.mrf.mxu0 }
 0x384   : > { %v889_v0 = vpack.c.bf16 %v885_v63, %v885_v63  ;;  %v962_v1 = vpop.f32.mrf.mxu2 }
 0x386   : > { %891 = vrot.lane.b32.xlu0 %v889_v0, %s1724_s28 }
 0x38b   : > { %v887_v2 = vpop.f32.mrf.mxu0 }
 0x3bd   : > { %v817_v3 = vpop.permute.xlu2 %816 }
 0x3be   : > { %820 = vst.msk [vmem:[#allocation5] sm:$0xf] %vm819_vm5, %v817_v3 }
 0x3d9   : > { %v967_v7 = vpop.permute.xlu2 %966 }
 0x3f8   : > { %v892_v6 = vpop.permute.xlu0 %891 }
 0x3f9   : > { %895 = vst.msk [vmem:[#allocation5] sm:$0xf] %vm894_vm6, %v892_v6 }
 0x3fa   : > { %970 = vst.msk [vmem:[#allocation5] sm:$0xf] %vm969_vm7, %v967_v7 }
 0x401   : > { %v971_v8 = vld [vmem:[#allocation5] sm:$0xf] }
 0x402   : > { %1253 = vmatmul.msk.bf16.vlgmr.msra.gmra.mxu3 %vm588_vm0, %v971_v8 }
 0x485   : > { %v1004_v10 = vpop.f32.mrf.mxu3 }
 0x486   : > { %v1005_v11 = vadd.f32 %v1390_v9, %v1004_v10 }
 0x488   : > { %1008 = vst.msk [vmem:[%s561_s24] sm:$0xff] %vm588_vm0, %v1005_v11 }
 0x489   : > { %1644 = shalt.err (!%p1641_p13)
}
 0x48a   : > { %1288 = dma.vmem_to_hbm [thread:$0]  (%p1873_p2), %s1024_s14, 128, %s1026_s29, %s1010_s20  }
 0x48d   : > { %v1006_v12 = vpop.f32.mrf.mxu3 }
 0x48e PF: > { %s2119_s15 = sld [smem:[#allocation24_spill]]  ;;  %p1314_p0 = pnand %p1194_p6, %p1880_p7 }
 0x48f   : > { %s2121_s12 = sld [smem:[#allocation26_spill]] }
 0x490   : > { %p1315_p4 = pneg %p1314_p0 }
 0x494   : > { %s1037_s28 = sand.u32 1, %s2119_s15  }
 0x495   : > { %s1038_s21 = scalar_lea.sflag [#allocation8], %s1037_s28 }
 0x496   : > { %1686 = dma.done.wait (%p1315_p4), %s1038_s21, 128  }
 0x497   : > { %1688 = vsyncadd (%p1315_p4), %s1038_s21, 4294967168  ;;  %s32_s22 = sadd.s32 1, %s2121_s12   ;;  %s2122_s26 = sld [smem:[#allocation29_spill]] }
 0x498   : > { %p29_p9 = scmp.ge.s32.totalorder %s32_s22, 4   ;;  %s2123_s20 = sld [smem:[#allocation25_spill]] }
 0x499   : > { %s2124_s21 = sld [smem:[#allocation27_spill]]  ;;  %s2125_s17 = smov %s1695_s18 }
 0x49a   : > { %s2126_s18 = smov %s1699_s19  ;;  %31 = sbr.rel (!%p29_p9) target bundleno = 18 (0x12), region = 153 }
 0x49d   : > { %s2127_s19 = smov %s2122_s26 }
 0x49f   :  { %1044 = vsyncpa [#allocation7], 1 }
 0x4a0   :  { %1046 = vsyncpa [#allocation7 + $0x1], 1 }
 0x4a1   :  { %1047 = vsyncpa [#allocation10], 1 }
 0x4a2   :  { %1049 = vsyncpa [#allocation10 + $0x1], 1 }
 0x4a3   :  { %1050 = vsyncpa [#allocation13], 1 }
 0x4a4   :  { %1051 = vsyncpa [#allocation16], 1 }
 0x4a5   :  { %1052 = vsyncpa [#allocation8], 1 }
 0x4a6   :  { %1054 = vsyncpa [#allocation8 + $0x1], 1 }

// kernel: tpu_custom_call.1
= control target key start
LH: loop header
LB: loop body
LE: loop exit
PB: predicated region body
PF: predicated region fallthrough
CT: control target
= control target key end

     0   :  { %s2062_s0 = inlined_call_operand.hbm [shape: bf16[2,8,32], index: 0, kind: input, shape index: {}]   ;;  %s2063_s1 = inlined_call_operand.hbm [shape: bf16[2,8,32], index: 1, kind: input, shape index: {}]   ;;  %s2064_s2 = inlined_call_operand.hbm [shape: bf16[2,8,32], index: 2, kind: input, shape index: {}]   ;;  %s2065_s3 = inlined_call_operand.hbm [shape: bf16[32,32], index: 3, kind: input, shape index: {}]   ;;  %s2066_s4 = inlined_call_operand.vmem [shape: f32[1,32], index: 4, kind: input, shape index: {}]   ;;  %s2067_s5 = inlined_call_operand.hbm [shape: bf16[32,32], index: 5, kind: input, shape index: {}]   ;;  %s2068_s6 = inlined_call_operand.vmem [shape: f32[1,32], index: 6, kind: input, shape index: {}]   ;;  %s2069_s7 = inlined_call_operand.hbm [shape: bf16[32,32], index: 7, kind: input, shape index: {}]   ;;  %s2070_s8 = inlined_call_operand.vmem [shape: f32[1,32], index: 8, kind: input, shape index: {}]   ;;  %s2071_s9 = inlined_call_operand.hbm [shape: bf16[32,32], index: 9, kind: input, shape index: {}]   ;;  %s2072_s10 = inlined_call_operand.vmem [shape: f32[1,32], index: 10, kind: input, shape index: {}]   ;;  %s2073_s11 = inlined_call_operand.hbm [shape: f32[2,8,32], index: 11, kind: output, shape index: {}]  }
   0x1   :  { %2087 = sst [smem:[#allocation31_spill]] %s2062_s0 }
   0x2   :  { %2088 = sst [smem:[#allocation32_spill]] %s2063_s1 }
   0x3   :  { %2089 = sst [smem:[#allocation33_spill]] %s2065_s3 }
   0x4   :  { %2090 = sst [smem:[#allocation34_spill]] %s2067_s5 }
   0x5   :  { %2091 = sst [smem:[#allocation35_spill]] %s2069_s7 }
   0x6   :  { %2092 = sst [smem:[#allocation36_spill]] %s2071_s9 }
   0x7   :  { %2093 = sst [smem:[#allocation37_spill]] %s2072_s10 }
   0x8   :  { %16 = vsyncpa [#allocation7], 0 }
   0x9   :  { %18 = vsyncpa [#allocation7 + $0x1], 0 }
   0xa   :  { %19 = vsyncpa [#allocation10], 0 }
   0xb   :  { %21 = vsyncpa [#allocation10 + $0x1], 0 }
   0xc   :  { %22 = vsyncpa [#allocation13], 0 }
   0xd   :  { %23 = vsyncpa [#allocation16], 0 }
   0xe   :  { %24 = vsyncpa [#allocation8], 0 }
   0xf   :  { %26 = vsyncpa [#allocation8 + $0x1], 0  ;;  %s1785_s17 = smov 0   ;;  %s1787_s18 = smov 0  }
  0x10   :  { %s1789_s19 = smov 0   ;;  %s1791_s20 = smov 0  }
  0x11   :  { %s1793_s21 = smov 0   ;;  %s1795_s22 = smov 0  }
  0x12 LB: > { %2094 = sst [smem:[#allocation24_spill]] %s1691_s17  ;;  %s1816_s23 = sadd.s32 4294967295, %s1711_s22   ;;  %s1711_s22 = sphi %s1795_s22, %s32_s22   ;;  %s1707_s21 = sphi %s1793_s21, %s2124_s21   ;;  %s1703_s20 = sphi %s1791_s20, %s2123_s20   ;;  %s1699_s19 = sphi %s1789_s19, %s2127_s19   ;;  %s1695_s18 = sphi %s1787_s18, %s2126_s18   ;;  %s1691_s17 = sphi %s1785_s17, %s2125_s17  }
  0x13   : > { %2095 = sst [smem:[#allocation25_spill]] %s1707_s21  ;;  %p1189_p0 = scmp.ge.s32.totalorder %s1711_s22, 1 }
  0x14   : > { %2096 = sst [smem:[#allocation26_spill]] %s1711_s22  ;;  %p67_p1 = scmp.eq.s32.totalorder %s1816_s23, 0 }
  0x15   : > { %p325_p2 = scmp.lt.s32.totalorder %s1711_s22, 3  ;;  %s2097_s3 = sld [smem:[#allocation33_spill]] }
  0x16   : > { %s1713_s28 = smov [#allocation12]   ;;  %p1194_p6 = scmp.ge.s32.totalorder %s1711_s22, 2 }
  0x17   : > { %p1824_p3 = pnand %p1189_p0, %p325_p2  ;;  %s338_s29 = sshll.u32 %s1713_s28, 4  ;;  %s339_s29 = int_to_ptr.vmem [resolvable:$true] %s338_s29 }
  0x18   : > { %s2100_s7 = sld [smem:[#allocation35_spill]]  ;;  %s2074_s15 = smov 64  }
  0x19   : > { %p1290_p4 = pneg %p1824_p3  ;;  %s2076_s16 = smov 4  }
  0x1a   : > { %s1716_s24 = smov [#allocation15]   ;;  %s1188_s28 = sadd.s32 4294967294, %s1711_s22  }
  0x1b   : > { %s336_s26 = sshll.u32 %s2097_s3, 4  ;;  %p1832_p5 = pnand %p1290_p4, %p67_p1  ;;  %s337_s26 = int_to_ptr.hbm [resolvable:$true] %s336_s26 }
  0x1c   : > { %s372_s25 = sshll.u32 %s1716_s24, 4  ;;  %s44_s12 = sadd.s32 1, %s1707_s21  ;;  %s373_s25 = int_to_ptr.vmem [resolvable:$true] %s372_s25 }
  0x1d   : > { %1293 = dma.hbm_to_vmem [thread:$0]  (!%p1832_p5), %s337_s26, 256, %s339_s29, [#allocation13], %s2074_s15, %s2074_s15, %s2076_s16  }
  0x1e   : > { %s370_s14 = sshll.u32 %s2100_s7, 4  ;;  %p46_p7 = scmp.ge.s32.totalorder %s44_s12, 2  ;;  %s371_s14 = int_to_ptr.hbm [resolvable:$true] %s370_s14 }
  0x1f   : > { %1299 = dma.hbm_to_vmem [thread:$0]  (!%p1832_p5), %s371_s14, 256, %s373_s25, [#allocation16], %s2074_s15, %s2074_s15, %s2076_s16  }
  0x20   : > { %s53_s13 = sadd.s32 1, %s1699_s19  ;;  %p60_p8 = scmp.ne.s32.totalorder %s1699_s19, %s1695_s18 }
  0x21   : > { %p61_p9 = scmp.eq.s32.totalorder %s1711_s22, 0  ;;  %s2129_s12 = smov (%p46_p7, %s44_s12), 0 }
  0x22   : > { %2101 = sst [smem:[#allocation27_spill]] %s2129_s12  ;;  %p66_p11 = scmp.ne.s32.totalorder %s1695_s18, %s1691_s17 }
  0x23   : > { %p1858_p10 = por %p61_p9, %p60_p8  ;;  %s48_s29 = ssub.s32 %s1707_s21, %s2129_s12 }
  0x24   : > { %p312_p12 = scmp.eq.s32.totalorder %s1816_s23, 1  ;;  %p51_p13 = scmp.eq.s32.totalorder %s48_s29, 0 }
  0x25   : > { %p1869_p0 = por %p67_p1, %p66_p11  ;;  %p318_p4 = scmp.eq.s32.totalorder %s1188_s28, 1 }
  0x26   : > { %p1873_p2 = por %p312_p12, %p60_p8  ;;  %p1321_p9 = scmp.lt.s32.totalorder %s1711_s22, 2 }
  0x27   : > { %s1878_s25 = scalar_select %p51_p13, %s1699_s19, %s53_s13  }
  0x28   : > { %s2104_s24 = scalar_select %p1873_p2, 1, 0 }
  0x29   : > { %2106 = sst [smem:[#allocation29_spill]] %s1878_s25  ;;  %p1880_p7 = por %p318_p4, %p66_p11 }
  0x2a   : > { %2105 = sst [smem:[#allocation28_spill]] %s2104_s24  ;;  %s2082_s16 = sand.u32 1, %s1699_s19  }
  0x2b   : > { %s2107_s15 = scalar_select %p1880_p7, 1, 0 }
  0x2c   : > { %s1887_s3 = sshll.u32 %s1707_s21, 2  ;;  %s1891_s29 = sshll.u32 %s2082_s16, 2 }
  0x2d   : > { %2108 = sst [smem:[#allocation30_spill]] %s2107_s15  ;;  %p1895_p8 = pnand %p1321_p9, %p1858_p10 }
  0x2e   : > { %s426_s28 = sand.u32 1, %s1711_s22   ;;  %s2110_s1 = sld [smem:[#allocation32_spill]] }
  0x2f   : > { %s430_s15 = scalar_lea.vmem [#allocation9], %s1891_s29  ;;  %s2111_s5 = sld [smem:[#allocation34_spill]] }
  0x30   : > { %s438_s21 = sshll.u32 %s430_s15, 4  ;;  %s427_s24 = scalar_lea.sflag [#allocation10], %s426_s28  ;;  %s439_s21 = int_to_ptr.vmem [resolvable:$true] %s438_s21 }
  0x31   : > { %s1717_s22 = smov [#allocation14]   ;;  %s2112_s9 = sld [smem:[#allocation36_spill]] }
  0x32   : > { %s355_s12 = sshll.u32 %s1717_s22, 4  ;;  %s2114_s16 = smov 64   ;;  %s356_s12 = int_to_ptr.vmem [resolvable:$true] %s355_s12 }
  0x33   : > { %s1718_s28 = smov [#allocation17]   ;;  %s2115_s0 = sld [smem:[#allocation31_spill]] }
  0x34   : > { %s434_s25 = scalar_lea.hbm %s2110_s1, %s1887_s3  ;;  %s410_s13 = scalar_lea.vmem [#allocation6], %s1891_s29 }
  0x35   : > { %s436_s17 = sshll.u32 %s434_s25, 4  ;;  %s353_s10 = sshll.u32 %s2111_s5, 4  ;;  %s437_s17 = int_to_ptr.hbm [resolvable:$true] %s436_s17  ;;  %s354_s10 = int_to_ptr.hbm [resolvable:$true] %s353_s10 }
  0x36   : > { %1309 = dma.hbm_to_vmem [thread:$0]  (!%p1895_p8), %s437_s17, 64, %s439_s21, %s427_s24  }
  0x37   : > { %s387_s15 = sshll.u32 %s2112_s9, 4  ;;  %s2113_s25 = smov 4   ;;  %s388_s15 = int_to_ptr.hbm [resolvable:$true] %s387_s15 }
  0x38   : > { %1296 = dma.hbm_to_vmem [thread:$0]  (!%p1832_p5), %s354_s10, 256, %s356_s12, [#allocation13], %s2114_s16, %s2114_s16, %s2113_s25  }
  0x39   : > { %s389_s17 = sshll.u32 %s1718_s28, 4  ;;  %s415_s22 = scalar_lea.hbm %s2115_s0, %s1887_s3  ;;  %s390_s17 = int_to_ptr.vmem [resolvable:$true] %s389_s17 }
  0x3a   : > { %1302 = dma.hbm_to_vmem [thread:$0]  (!%p1832_p5), %s388_s15, 256, %s390_s17, [#allocation16], %s2114_s16, %s2114_s16, %s2113_s25  }
  0x3b   : > { %s417_s1 = sshll.u32 %s415_s22, 4  ;;  %s419_s5 = sshll.u32 %s410_s13, 4  ;;  %s418_s1 = int_to_ptr.hbm [resolvable:$true] %s417_s1  ;;  %s420_s5 = int_to_ptr.vmem [resolvable:$true] %s419_s5 }
  0x3c   : > { %s2116_s9 = sand.u32 1, %s1699_s19   ;;  %s453_s21 = scalar_lea.hbm %s2064_s2, %s1887_s3 }
  0x3d   : > { %s407_s10 = scalar_lea.sflag [#allocation7], %s2116_s9  ;;  %s455_s26 = sshll.u32 %s453_s21, 4  ;;  %s456_s26 = int_to_ptr.hbm [resolvable:$true] %s455_s26 }
  0x3e   : > { %1306 = dma.hbm_to_vmem [thread:$0]  (!%p1895_p8), %s418_s1, 64, %s420_s5, %s407_s10  }
  0x3f   : > { %s449_s0 = scalar_lea.vmem [#allocation11], %s1891_s29  ;;  %466 = sbr.rel (%p1824_p3) target bundleno = 1166 (0x48e), region = 64 }
  0x40   : > { %s457_s30 = sshll.u32 %s449_s0, 4  ;;  %s1942_s15 = sand.u32 (!%p1824_p3), 1, %s1695_s18   ;;  %s458_s30 = int_to_ptr.vmem [resolvable:$true] %s457_s30 }
  0x41   : > { %1312 = dma.hbm_to_vmem [thread:$0]  (!%p1895_p8), %s456_s26, 64, %s458_s30, %s427_s24  }
  0x42   : > { %s1945_s5 = sshll.u32 (!%p1824_p3), %s1942_s15, 2  ;;  %s469_s3 = scalar_lea.sflag (!%p1824_p3), [#allocation7], %s1942_s15 }
  0x43   : > { %s472_s9 = scalar_lea.vmem (!%p1824_p3), [#allocation6], %s1945_s5 }
  0x44   : > { %1670 = dma.done.wait (%p1869_p0), %s469_s3, 64  }
  0x45   : > { %1672 = vsyncadd (%p1869_p0), %s469_s3, 4294967232  ;;  %s478_s0 = sand.u32 1, %s1816_s23   ;;  %s482_s27 = scalar_lea.vmem [#allocation9], %s1945_s5 }
  0x46   : > { %s479_s7 = scalar_lea.sflag [#allocation10], %s478_s0 }
  0x47   : > { %1674 = dma.done.wait (%p1869_p0), %s479_s7, 128  }
  0x48   : > { %1676 = vsyncadd (%p1869_p0), %s479_s7, 4294967168  ;;  %s492_s24 = scalar_lea.vmem [#allocation11], %s1945_s5 }
  0x49   : > { %1678 = dma.done.wait (%p67_p1), [#allocation13], 512  }
  0x4a   : > { %1680 = vsyncadd (%p67_p1), [#allocation13], 4294966784 }
  0x4b   : > { %1682 = dma.done.wait (%p67_p1), [#allocation16], 512  }
  0x4c   : > { %1684 = vsyncadd (%p67_p1), [#allocation16], 4294966784  ;;  %v1259_v0 = vld [vmem:[#allocation14 + $0x8] sm:$0xff]  ;;  %v1263_v1 = vld [vmem:[#allocation12 + $0x8] sm:$0xff]  ;;  %vm588_vm0 = vcmask 261120   ;;  %vm606_vm1 = vcmask 257024  }
  0x4d   : > { %v1258_v2 = vld [vmem:[#allocation14] sm:$0xff]  ;;  %598 = vmatpush.bf16.msra.mxu0 %v1259_v0  ;;  %678 = vmatpush.bf16.msra.mxu2 %v1263_v1  ;;  %v1262_v3 = vld [vmem:[#allocation12] sm:$0xff]  ;;  %v647_v5 = vld [vmem:[%s472_s9] sm:$0xf]  ;;  %vm691_vm2 = vcmask 64512   ;;  %s1719_s16 = smov 112  }
  0x4e   : > { %v567_v4 = vld [vmem:[%s482_s27] sm:$0xf]  ;;  %v1387_v6 = vld [vmem:[%s2068_s6] ss:$0 sm:$0xff]  ;;  %v1261_v7 = vld [vmem:[#allocation15 + $0x8] sm:$0xff]  ;;  %s1720_s17 = smov 120  }
  0x4f   : > { %638 = vmatpush.bf16.msra.mxu1 %v1261_v7  ;;  %v1388_v11 = vld [vmem:[%s2066_s4] ss:$0 sm:$0xff]  ;;  %s1721_s22 = smov 104   ;;  %v1260_v38 = vld [vmem:[#allocation15] sm:$0xff]  ;;  %vm726_vm3 = vcmask 1043456   ;;  %vm744_vm4 = vcmask 60416  }
  0x50   : > { %v608_v39 = vld [vmem:[%s492_s24] sm:$0xf]  ;;  %s1722_s10 = smov 8   ;;  %s1723_s12 = smov 24   ;;  %vm819_vm5 = vcmask 126016   ;;  %vm894_vm6 = vcmask 191616  }
  0x51   : > { %599 = vmatpush.bf16.msra.mxu0 %v1258_v2  ;;  %679 = vmatpush.bf16.msra.mxu2 %v1262_v3  ;;  %v1389_v52 = vld [vmem:[%s2070_s8] ss:$0 sm:$0xff]  ;;  %s1724_s28 = smov 16   ;;  %vm969_vm7 = vcmask 257216   ;;  %s1255_s21 = sshll.u32 %s1703_s20, 3 }
  0x52   : > { %s1209_s26 = sshll.u32 %s1942_s15, 3  ;;  %s1021_s9 = scalar_lea.hbm %s2073_s11, %s1255_s21 }
  0x53   : > { %639 = vmatpush.bf16.msra.mxu1 %v1260_v38  ;;  %s2118_s27 = sld [smem:[#allocation37_spill]]  ;;  %s561_s24 = scalar_lea.vmem [#allocation18], %s1209_s26 }
  0x54   : > { %1218 = vmatmul.msk.bf16.vlgmr.msra.gmra.mxu0 %vm588_vm0, %v567_v4  ;;  %1236 = vmatmul.msk.bf16.vlgmr.msra.gmra.mxu2 %vm588_vm0, %v647_v5  ;;  %s1023_s14 = sshll.u32 %s561_s24, 4  ;;  %s1025_s29 = sshll.u32 %s1021_s9, 4  ;;  %s1024_s14 = int_to_ptr.vmem [resolvable:$true] %s1023_s14  ;;  %s1026_s29 = int_to_ptr.hbm [resolvable:$true] %s1025_s29 }
  0x55   : > { %s1010_s20 = scalar_lea.sflag [#allocation8], %s1942_s15  ;;  %s1631_s23 = sshra.s32 %s1026_s29, 4  ;;  %s1632_s23 = int_to_ptr.hbm [resolvable:$true] %s1631_s23 }
  0x56   : > { %1227 = vmatmul.msk.bf16.vlgmr.msra.gmra.mxu1 %vm588_vm0, %v608_v39  ;;  %s1633_s25 = scalar_lea.hbm %s1632_s23, 8  ;;  %p1638_p10 = scmp.lt.s32.totalorder %s1632_s23, %s2073_s11 }
  0x57   : > { %p1634_p1 = scmp.ne.s32.totalorder %s1632_s23, %s1633_s25 }
  0x59   : > { %p1635_p3 = pnand %p1634_p1, %p1873_p2 }
  0x5b   : > { %p1636_p5 = pneg %p1635_p3 }
  0xd1   : > { %v601_v8 = vpop.f32.mrf.mxu0 }
  0xd2   : > { %v602_v9 = vadd.f32 %v1387_v6, %v601_v8 }
  0xd3   : > { %v641_v53 = vpop.f32.mrf.mxu1 }
  0xd4   : > { %v605_v10 = vpack.c.bf16 %v602_v9, %v602_v9  ;;  %v642_v54 = vadd.f32 %v1389_v52, %v641_v53 }
  0xd6   : > { %607 = vst.msk [vmem:[#allocation3] sm:$0xf] %vm606_vm1, %v605_v10  ;;  %v645_v55 = vpack.c.bf16 %v642_v54, %v642_v54 }
  0xd7   : > { %v681_v12 = vpop.f32.mrf.mxu2 }
  0xd8   : > { %v682_v13 = vadd.f32 %v1388_v11, %v681_v12  ;;  %646 = vst.msk [vmem:[#allocation4] sm:$0xf] %vm606_vm1, %v645_v55 }
  0xd9   : > { %v603_v14 = vpop.f32.mrf.mxu0 }
  0xda   : > { %v685_v15 = vpack.c.bf16 %v682_v13, %v682_v13 }
  0xdb   : > { %v643_v56 = vpop.f32.mrf.mxu1 }
  0xdc   : > { %687 = vst.msk [vmem:[#allocation2] sm:$0xf] %vm606_vm1, %v685_v15 }
  0xdd   : > { %v689_v16 = vld [vmem:[#allocation3] sm:$0xf] }
  0xde   : > { %v822_v17 = vld [vmem:[#allocation3] sm:$0xf]  ;;  %v696_v19 = vsel %vm691_vm2, %v689_v16, 0 }
  0xdf   : > { %v747_v18 = vld [vmem:[#allocation3] sm:$0xf]  ;;  %v830_v20 = vunpack.c.l.b16 %v822_v17  ;;  %v683_v22 = vpop.f32.mrf.mxu2  ;;  %705 = vmatpush.bf16.xpose.msra.mxu3 %v696_v19  ;;  %v690_v57 = vld [vmem:[#allocation4] sm:$0xf] }
  0xe0   : > { %v755_v21 = vunpack.c.l.b16 %v747_v18  ;;  %v897_v25 = vld [vmem:[#allocation3] sm:$0xf]  ;;  %v728_v58 = vsel %vm726_vm3, %v690_v57, 0  ;;  %v748_v9 = vld [vmem:[#allocation4] sm:$0xf] }
  0xe1   : > { %v831_v23 = vpack.c.b16 %v830_v20, %v830_v20  ;;  %v905_v30 = vunpack.c.l.b16 %v897_v25  ;;  %737 = vmatpush.bf16.msrb.mxu0 %v728_v58  ;;  %v791_v10 = vunpack.c.l.b16 %v748_v9  ;;  %v1390_v9 = vld [vmem:[%s2118_s27] ss:$0 sm:$0xff] }
  0xe2   : > { %v756_v24 = vpack.c.b16 %v755_v21, %v755_v21 }
  0xe3   : > { %832 = vrot.lane.b32.xlu1 %v831_v23, %s1719_s16  ;;  %v688_v26 = vld [vmem:[#allocation2] sm:$0xf]  ;;  %v906_v35 = vpack.c.b16 %v905_v30, %v905_v30  ;;  %v792_v11 = vpack.c.b16 %v791_v10, %v791_v10 }
  0xe4   : > { %757 = vrot.lane.b32.xlu0 %v756_v24, %s1720_s17  ;;  %v821_v27 = vld [vmem:[#allocation2] sm:$0xf] }
  0xe5   : > { %v746_v28 = vld [vmem:[#allocation2] sm:$0xf]  ;;  %v825_v29 = vunpack.c.l.b16 %v821_v27 }
  0xe6   : > { %v750_v31 = vunpack.c.l.b16 %v746_v28  ;;  %1237 = vmatmul.msk.bf16.vlgmr.msra.gmra.mxu3 %vm691_vm2, %v688_v26  ;;  %v896_v34 = vld [vmem:[#allocation2] sm:$0xf] }
  0xe7   : > { %v826_v32 = vpack.c.b16 %v825_v29, %v825_v29  ;;  %v900_v36 = vunpack.c.l.b16 %v896_v34 }
  0xe8   : > { %v751_v33 = vpack.c.b16 %v750_v31, %v750_v31 }
  0xe9   : > { %827 = vrot.lane.b32.xlu2 %v826_v32, %s1719_s16  ;;  %v901_v37 = vpack.c.b16 %v900_v36, %v900_v36  ;;  %v823_v36 = vld [vmem:[#allocation4] sm:$0xf] }
  0xeb   : > { %907 = vrot.lane.b32.xlu1 %v906_v35, %s1721_s22 }
  0xec   : > { %752 = vrot.lane.b32.xlu0 %v751_v33, %s1720_s17  ;;  %v898_v33 = vld [vmem:[#allocation4] sm:$0xf] }
  0xed   : > { %v941_v34 = vunpack.c.l.b16 %v898_v33 }
  0xef   : > { %v942_v35 = vpack.c.b16 %v941_v34, %v941_v34 }
  0xf1   : > { %902 = vrot.lane.b32.xlu2 %v901_v37, %s1721_s22  ;;  %v866_v37 = vunpack.c.l.b16 %v823_v36 }
  0xf3   : > { %v867_v38 = vpack.c.b16 %v866_v37, %v866_v37 }
 0x143   : > { %v828_v44 = vpop.permute.xlu2 %827 }
 0x14b   : > { %v903_v50 = vpop.permute.xlu2 %902 }
 0x155   : > { %v833_v40 = vpop.permute.xlu1 %832 }
 0x156   : > { %v758_v41 = vpop.permute.xlu0 %757  ;;  %v838_v43 = vsel %vm691_vm2, %v833_v40, 0 }
 0x157   : > { %v763_v42 = vsel %vm691_vm2, %v758_v41, 0  ;;  %847 = vmatpush.bf16.xpose.msrb.mxu3 %v838_v43 }
 0x158   : > { %772 = vmatpush.bf16.xpose.msrb.mxu1 %v763_v42 }
 0x15d   : > { %v908_v45 = vpop.permute.xlu1 %907 }
 0x15e   : > { %v753_v46 = vpop.permute.xlu0 %752  ;;  %v913_v47 = vsel %vm691_vm2, %v908_v45, 0  ;;  %1241 = vmatmul.msk.bf16.vlgmr.msrb.gmra.mxu3 %vm691_vm2, %v828_v44 }
 0x15f   : > { %1239 = vmatmul.msk.bf16.vlgmr.msrb.gmra.mxu1 %vm691_vm2, %v753_v46 }
 0x160   : > { %922 = vmatpush.bf16.xpose.msra.mxu1 %v913_v47 }
 0x169   : > { %v707_v48 = vpop.f32.mrf.mxu3 }
 0x16a   : > { %v711_v49 = vsel %vm691_vm2, %v707_v48, -inf }
 0x16b   : > { %712 = vmax.xlane.f32.xlu1 %v711_v49 }
 0x16f   : > { %1243 = vmatmul.msk.bf16.vlgmr.msra.gmra.mxu1 %vm691_vm2, %v903_v50 }
 0x171   : > { %v709_v51 = vpop.f32.mrf.mxu3 }
 0x1dc   : > { %v774_v59 = vpop.f32.mrf.mxu1 }
 0x1dd   : > { %v778_v60 = vsel %vm691_vm2, %v774_v59, -inf }
 0x1de   : > { %779 = vmax.xlane.f32.xlu0 %v778_v60  ;;  %v713_v61 = vpop.xlane.xlu1 %712 }
 0x1df   : > { %v714_v62 = vsub.f32 %v707_v48, %v713_v61 }
 0x1e1   : > { %v849_v63 = vpop.f32.mrf.mxu3  ;;  %v715_v0 = vmul.f32 1.442695, %v714_v62 }
 0x1e2   : > { %v853_v8 = vsel %vm691_vm2, %v849_v63, -inf }
 0x1e3   : > { %1391 = vpow2.f32 %v715_v0 }
 0x1e4   : > { %v776_v1 = vpop.f32.mrf.mxu1 }
 0x1e9   : > { %v851_v2 = vpop.f32.mrf.mxu3  ;;  %v1392_v3 = vpop.eup %1391 }
 0x1ea   : > { %v717_v5 = vsel %vm691_vm2, %v1392_v3, 0.0 }
 0x1eb   : > { %718 = vadd.xlane.f32.xlu1 %v717_v5  ;;  %v1264_v5 = vld [vmem:[#allocation17] sm:$0xff] }
 0x1ec   : > { %v924_v4 = vpop.f32.mrf.mxu1 }
 0x1ed   : > { %v928_v6 = vsel %vm691_vm2, %v924_v4, -inf }
 0x1ee   : > { %929 = vmax.xlane.f32.xlu2 %v928_v6 }
 0x1f4   : > { %v926_v7 = vpop.f32.mrf.mxu1 }
 0x1f6   : > { %854 = vmax.xlane.f32.xlu2 %v853_v8 }
 0x20e   : > { %793 = vrot.lane.b32.xlu2 %v792_v11, %s1720_s17 }
 0x251   : > { %v780_v12 = vpop.xlane.xlu0 %779 }
 0x252   : > { %v781_v13 = vsub.f32 %v774_v59, %v780_v12 }
 0x254   : > { %v782_v14 = vmul.f32 1.442695, %v781_v13 }
 0x256   : > { %1393 = vpow2.f32 %v782_v14 }
 0x25c   : > { %v1394_v15 = vpop.eup %1393 }
 0x25d   : > { %v784_v16 = vsel %vm691_vm2, %v1394_v15, 0.0 }
 0x25e   : > { %785 = vadd.xlane.f32.xlu0 %v784_v16  ;;  %v719_v17 = vpop.xlane.xlu1 %718 }
 0x25f   : > { %1395 = vrcp.f32 %v719_v17 }
 0x261   : > { %v930_v18 = vpop.xlane.xlu2 %929 }
 0x262   : > { %v931_v19 = vsub.f32 %v924_v4, %v930_v18  ;;  %v1265_v4 = vld [vmem:[#allocation17 + $0x8] sm:$0xff] }
 0x263   : > { %1001 = vmatpush.bf16.msra.mxu3 %v1265_v4 }
 0x264   : > { %v932_v20 = vmul.f32 1.442695, %v931_v19 }
 0x265   : > { %v1396_v21 = vpop.eup %1395 }
 0x266   : > { %1397 = vpow2.f32 %v932_v20  ;;  %v721_v22 = vmul.f32 %v1396_v21, %v1392_v3 }
 0x267   : > { %1002 = vmatpush.bf16.msra.mxu3 %v1264_v5 }
 0x268   : > { %v722_v25 = vpack.c.bf16 %v721_v22, %v721_v22 }
 0x269   : > { %v855_v23 = vpop.xlane.xlu2 %854 }
 0x26a   : > { %v856_v24 = vsub.f32 %v849_v63, %v855_v23  ;;  %1238 = vmatmul.msk.bf16.vlgmr.msrb.gmra.mxu0 %vm691_vm2, %v722_v25 }
 0x26c   : > { %v1398_v26 = vpop.eup %1397  ;;  %v857_v27 = vmul.f32 1.442695, %v856_v24 }
 0x26d   : > { %v934_v28 = vsel %vm691_vm2, %v1398_v26, 0.0 }
 0x26e   : > { %1399 = vpow2.f32 %v857_v27  ;;  %935 = vadd.xlane.f32.xlu0 %v934_v28 }
 0x271   : > { %v794_v29 = vpop.permute.xlu2 %793 }
 0x272   : > { %v799_v30 = vsel %vm726_vm3, %v794_v29, 0 }
 0x273   : > { %808 = vmatpush.bf16.msrb.mxu2 %v799_v30 }
 0x274   : > { %v1400_v31 = vpop.eup %1399 }
 0x275   : > { %v859_v32 = vsel %vm691_vm2, %v1400_v31, 0.0 }
 0x276   : > { %860 = vadd.xlane.f32.xlu1 %v859_v32 }
 0x282   : > { %943 = vrot.lane.b32.xlu0 %v942_v35, %s1721_s22  ;;  %s1637_s22 = scalar_lea.hbm %s2073_s11, 16 }
 0x283   : > { %p1639_p11 = scmp.lt.s32.totalorder %s1637_s22, %s1633_s25 }
 0x285   : > { %p1640_p12 = por %p1639_p11, %p1638_p10 }
 0x287   : > { %p1641_p13 = pnand %p1640_p12, %p1636_p5 }
 0x28f   : > { %868 = vrot.lane.b32.xlu1 %v867_v38, %s1719_s16 }
 0x2d1   : > { %v786_v39 = vpop.xlane.xlu0 %785 }
 0x2d2   : > { %1401 = vrcp.f32 %v786_v39 }
 0x2d8   : > { %v1402_v40 = vpop.eup %1401 }
 0x2d9   : > { %v788_v41 = vmul.f32 %v1402_v40, %v1394_v15 }
 0x2db   : > { %v789_v42 = vpack.c.bf16 %v788_v41, %v788_v41 }
 0x2dd   : > { %1240 = vmatmul.msk.bf16.vlgmr.msrb.gmra.mxu2 %vm691_vm2, %v789_v42 }
 0x2e1   : > { %v936_v43 = vpop.xlane.xlu0 %935 }
 0x2e2   : > { %1403 = vrcp.f32 %v936_v43 }
 0x2e7   : > { %v739_v44 = vpop.f32.mrf.mxu0 }
 0x2e8   : > { %v743_v45 = vpack.c.bf16 %v739_v44, %v739_v44  ;;  %v1404_v46 = vpop.eup %1403 }
 0x2e9   : > { %v938_v48 = vmul.f32 %v1404_v46, %v1398_v26  ;;  %v861_v49 = vpop.xlane.xlu1 %860 }
 0x2ea   : > { %745 = vst.msk [vmem:[#allocation5] sm:$0xf] %vm744_vm4, %v743_v45  ;;  %1405 = vrcp.f32 %v861_v49 }
 0x2eb   : > { %v939_v52 = vpack.c.bf16 %v938_v48, %v938_v48 }
 0x2ef   : > { %v741_v47 = vpop.f32.mrf.mxu0 }
 0x2f0   : > { %v1406_v53 = vpop.eup %1405 }
 0x2f1   : > { %v863_v54 = vmul.f32 %v1406_v53, %v1400_v31 }
 0x2f3   : > { %v864_v57 = vpack.c.bf16 %v863_v54, %v863_v54 }
 0x2f4   : > { %v944_v50 = vpop.permute.xlu0 %943 }
 0x2f5   : > { %v949_v51 = vsel %vm726_vm3, %v944_v50, 0 }
 0x2f6   : > { %958 = vmatpush.bf16.msra.mxu2 %v949_v51 }
 0x2f9   : > { %1244 = vmatmul.msk.bf16.vlgmr.msra.gmra.mxu2 %vm691_vm2, %v939_v52 }
 0x301   : > { %v869_v55 = vpop.permute.xlu1 %868 }
 0x302   : > { %v874_v56 = vsel %vm726_vm3, %v869_v55, 0 }
 0x303   : > { %883 = vmatpush.bf16.msra.mxu0 %v874_v56 }
 0x306   : > { %1242 = vmatmul.msk.bf16.vlgmr.msra.gmra.mxu0 %vm691_vm2, %v864_v57 }
 0x360   : > { %v810_v58 = vpop.f32.mrf.mxu2 }
 0x361   : > { %v814_v59 = vpack.c.bf16 %v810_v58, %v810_v58 }
 0x363   : > { %816 = vrot.lane.b32.xlu2 %v814_v59, %s1722_s10 }
 0x368   : > { %v812_v60 = vpop.f32.mrf.mxu2 }
 0x37c   : > { %v960_v61 = vpop.f32.mrf.mxu2 }
 0x37d   : > { %v964_v62 = vpack.c.bf16 %v960_v61, %v960_v61 }
 0x37f   : > { %966 = vrot.lane.b32.xlu2 %v964_v62, %s1723_s12 }
 0x383   : > { %v885_v63 = vpop.f32.mrf.mxu0 }
 0x384   : > { %v889_v0 = vpack.c.bf16 %v885_v63, %v885_v63  ;;  %v962_v1 = vpop.f32.mrf.mxu2 }
 0x386   : > { %891 = vrot.lane.b32.xlu0 %v889_v0, %s1724_s28 }
 0x38b   : > { %v887_v2 = vpop.f32.mrf.mxu0 }
 0x3bd   : > { %v817_v3 = vpop.permute.xlu2 %816 }
 0x3be   : > { %820 = vst.msk [vmem:[#allocation5] sm:$0xf] %vm819_vm5, %v817_v3 }
 0x3d9   : > { %v967_v7 = vpop.permute.xlu2 %966 }
 0x3f8   : > { %v892_v6 = vpop.permute.xlu0 %891 }
 0x3f9   : > { %895 = vst.msk [vmem:[#allocation5] sm:$0xf] %vm894_vm6, %v892_v6 }
 0x3fa   : > { %970 = vst.msk [vmem:[#allocation5] sm:$0xf] %vm969_vm7, %v967_v7 }
 0x401   : > { %v971_v8 = vld [vmem:[#allocation5] sm:$0xf] }
 0x402   : > { %1253 = vmatmul.msk.bf16.vlgmr.msra.gmra.mxu3 %vm588_vm0, %v971_v8 }
 0x485   : > { %v1004_v10 = vpop.f32.mrf.mxu3 }
 0x486   : > { %v1005_v11 = vadd.f32 %v1390_v9, %v1004_v10 }
 0x488   : > { %1008 = vst.msk [vmem:[%s561_s24] sm:$0xff] %vm588_vm0, %v1005_v11 }
 0x489   : > { %1644 = shalt.err (!%p1641_p13)
}
 0x48a   : > { %1288 = dma.vmem_to_hbm [thread:$0]  (%p1873_p2), %s1024_s14, 128, %s1026_s29, %s1010_s20  }
 0x48d   : > { %v1006_v12 = vpop.f32.mrf.mxu3 }
 0x48e PF: > { %s2119_s15 = sld [smem:[#allocation24_spill]]  ;;  %p1314_p0 = pnand %p1194_p6, %p1880_p7 }
 0x48f   : > { %s2121_s12 = sld [smem:[#allocation26_spill]] }
 0x490   : > { %p1315_p4 = pneg %p1314_p0 }
 0x494   : > { %s1037_s28 = sand.u32 1, %s2119_s15  }
 0x495   : > { %s1038_s21 = scalar_lea.sflag [#allocation8], %s1037_s28 }
 0x496   : > { %1686 = dma.done.wait (%p1315_p4), %s1038_s21, 128  }
 0x497   : > { %1688 = vsyncadd (%p1315_p4), %s1038_s21, 4294967168  ;;  %s32_s22 = sadd.s32 1, %s2121_s12   ;;  %s2122_s26 = sld [smem:[#allocation29_spill]] }
 0x498   : > { %p29_p9 = scmp.ge.s32.totalorder %s32_s22, 4   ;;  %s2123_s20 = sld [smem:[#allocation25_spill]] }
 0x499   : > { %s2124_s21 = sld [smem:[#allocation27_spill]]  ;;  %s2125_s17 = smov %s1695_s18 }
 0x49a   : > { %s2126_s18 = smov %s1699_s19  ;;  %31 = sbr.rel (!%p29_p9) target bundleno = 18 (0x12), region = 153 }
 0x49d   : > { %s2127_s19 = smov %s2122_s26 }
 0x49f   :  { %1044 = vsyncpa [#allocation7], 1 }
 0x4a0   :  { %1046 = vsyncpa [#allocation7 + $0x1], 1 }
 0x4a1   :  { %1047 = vsyncpa [#allocation10], 1 }
 0x4a2   :  { %1049 = vsyncpa [#allocation10 + $0x1], 1 }
 0x4a3   :  { %1050 = vsyncpa [#allocation13], 1 }
 0x4a4   :  { %1051 = vsyncpa [#allocation16], 1 }
 0x4a5   :  { %1052 = vsyncpa [#allocation8], 1 }
 0x4a6   :  { %1054 = vsyncpa [#allocation8 + $0x1], 1 }

</bundles_post_ra>
